<compile_context>
chip_gen: v7x
topology: tpu7x:2x2x1
jax: 0.10.0
libtpu: 0.0.40
codegen_flags: <defaults>
</compile_context>

<pallas_src>
import functools

import jax
import jax.numpy as jnp
from jax import lax
from jax.experimental import pallas as pl
from jax.experimental.pallas import tpu as pltpu


def _bilstm_attention_kernel(
    emb_ref,        # (S, Bb, D)   f32   seq-major batch chunk
    wcat_ref,       # (D, 8h)      bf16  fused + gate-interleaved input weights (both dirs)
    bcat_ref,       # (1, 8h)      f32   fused bias (bih + bhh, both dirs)
    wrec_ref,       # (2h, 8h)     f32   block-diagonal recurrent weights (both dirs)
    h0_ref, c0_ref,  # (Bb, 2h)    f32   [h_f | h_b], [c_f | c_b]
    attw_ref,       # (Bb, 2h)     f32   attention weight
    relT_ref,       # (2h, TP)     f32   relation table^T, tag dim padded to TP lanes
    rbias_ref,      # (Bb, TP)     f32   relation bias, tag-padded
    out_ref,        # (Bb, TP)     f32
    xg_ref,         # scratch (S, Bb, 8h) f32  input-gate contributions
    lstm_ref,       # scratch (S, Bb, 2h) f32  bi-LSTM outputs
    *, num_tags, matmul_dtype,
):
    S, Bb, D = emb_ref.shape
    G = wcat_ref.shape[1]       # 8 * h
    hh = G // 8                 # hidden_dim // 2
    Hd = 2 * hh                 # hidden_dim
    TP = out_ref.shape[1]

    # ---- fused input projection (both directions, all gates): one MXU matmul with
    # bf16 operands and f32 accumulation.
    x2 = emb_ref[...].reshape(S * Bb, D).astype(matmul_dtype)
    xg = jnp.dot(x2, wcat_ref[...], preferred_element_type=jnp.float32) + bcat_ref[...]
    xg_ref[...] = xg.reshape(S, Bb, G)

    # Gate-column layout [i_f,i_b | f_f,f_b | o_f,o_b | g_f,g_b]: within each Hd-wide gate
    # block, the first hh lanes belong to the forward direction.
    lane_g = lax.broadcasted_iota(jnp.int32, (Bb, G), 1)
    fwd_g = (lane_g % Hd) < hh

    # ---- hoist the fwd/bwd time mirroring off the recurrence: in-place pairwise select so
    # xg_ref[t] holds forward-gate inputs of time t and backward-gate inputs of time S-1-t.
    for t in range(S // 2):
        a = xg_ref[t]
        b = xg_ref[S - 1 - t]
        xg_ref[t] = jnp.where(fwd_g, a, b)
        xg_ref[S - 1 - t] = jnp.where(fwd_g, b, a)

    wrec = wrec_ref[...]   # loop-invariant recurrent weight, kept VMEM/vreg resident
    # TODO(synk): wrec/h could optionally be cast to bf16 as well (extra v5e win); kept f32
    # because the per-step matmul is MXU-latency (not throughput) bound on the serial chain.

    def step(t, carry):
        h, c = carry                                                    # (Bb, 2h) [fwd|bwd]
        gates = xg_ref[t] + jnp.dot(h, wrec, preferred_element_type=jnp.float32)  # (Bb, 8h)
        sig = jax.nn.sigmoid(gates[:, 0:3 * Hd])                        # one issue: i | f | o
        i = sig[:, 0:Hd]
        f = sig[:, Hd:2 * Hd]
        o = sig[:, 2 * Hd:3 * Hd]
        g = jnp.tanh(gates[:, 3 * Hd:4 * Hd])
        c_new = f * c + i * g
        h_new = o * jnp.tanh(c_new)
        # Single full-row store; backward half is time-reversed here and fixed up after the
        # loop (off the serial critical chain).
        lstm_ref[pl.ds(t, 1), :, :] = h_new[None]
        return (h_new, c_new)

    lax.fori_loop(0, S, step, (h0_ref[...], c0_ref[...]), unroll=True)

    # ---- undo the time reversal of the backward half (vectorized, off the recurrence).
    lane_h = lax.broadcasted_iota(jnp.int32, (Bb, Hd), 1)
    fwd_h = lane_h < hh
    for t in range(S // 2):
        a = lstm_ref[t]
        b = lstm_ref[S - 1 - t]
        lstm_ref[t] = jnp.where(fwd_h, a, b)
        lstm_ref[S - 1 - t] = jnp.where(fwd_h, b, a)

    # ---- attention over the sequence (dropout_lstm == identity in eval mode).
    lstm = lstm_ref[...]                                    # (S, Bb, Hd)
    aw = attw_ref[...]                                      # (Bb, Hd)
    M = jnp.tanh(lstm)
    scores = jnp.sum(M * aw, axis=-1, keepdims=True)        # (S, Bb, 1)
    smax = jnp.max(scores, axis=0, keepdims=True)
    e = jnp.exp(scores - smax)
    a = e / jnp.sum(e, axis=0, keepdims=True)               # exact softmax over seq
    att_out = jnp.tanh(jnp.sum(lstm * a, axis=0))           # (Bb, Hd)

    # ---- relation scores + softmax over real tags; lane-dense (Bb, TP) store.
    res = jnp.dot(att_out, relT_ref[...], preferred_element_type=jnp.float32) + rbias_ref[...]
    tag = lax.broadcasted_iota(jnp.int32, (Bb, TP), 1)
    res = jnp.where(tag < num_tags, res, -1e30)             # mask padded tag lanes
    rmax = jnp.max(res, axis=-1, keepdims=True)
    re = jnp.exp(res - rmax)
    out_ref[...] = re / jnp.sum(re, axis=-1, keepdims=True)


def _round_up(x, m):
    return ((x + m - 1) // m) * m


def _pick_block_batch(batch, max_bb=128):
    """Rows per grid program: multiple of 8 sublanes, capped at 128 (vreg pressure in the
    fully-unrolled recurrence), and >= 2 grid programs when the batch allows (v7x: 2 TCs)."""
    b8 = _round_up(batch, 8)
    bb = min(max_bb, b8)
    if b8 // bb < 2 and b8 >= 16:
        bb = max(8, (b8 // 2 // 8) * 8)
    return bb


def bilstm_attention_forward(emb, p, *, block_batch=128, matmul_dtype=jnp.bfloat16):
    """emb: (B, S, D) float32; p: parameter dict. Returns (B, T) softmax scores."""
    B, S, D = emb.shape
    hh = p["whh_f"].shape[1]
    Hd = 2 * hh
    G = 8 * hh
    T = p["rel_table"].shape[0]
    TP = _round_up(T, 128)                  # lane-dense padded tag dimension
    f32 = jnp.float32

    Bb = _pick_block_batch(B, block_batch)
    B_pad = _round_up(B, Bb)
    pad = B_pad - B

    # ---- fused / interleaved weight repacking.
    # PyTorch LSTM gate row-order is (i, f, g, o); permute to (i, f, o, g) so the three
    # sigmoids cover one contiguous lane range, and interleave fwd/bwd per gate:
    # column layout [i_f,i_b | f_f,f_b | o_f,o_b | g_f,g_b].
    perm = jnp.array([0, 1, 3, 2])
    wf = p["wih_f"].T.reshape(D, 4, hh)[:, perm, :]
    wb = p["wih_b"].T.reshape(D, 4, hh)[:, perm, :]
    wcat = jnp.stack([wf, wb], axis=2).reshape(D, G).astype(matmul_dtype)      # (D, 8h)

    bfw = (p["bih_f"] + p["bhh_f"]).reshape(4, hh)[perm, :]
    bbw = (p["bih_b"] + p["bhh_b"]).reshape(4, hh)[perm, :]
    bcat = jnp.stack([bfw, bbw], axis=1).reshape(1, G).astype(f32)             # (1, 8h)

    wrf = p["whh_f"].T.reshape(hh, 4, hh)[:, perm, :]
    wrb = p["whh_b"].T.reshape(hh, 4, hh)[:, perm, :]
    z = jnp.zeros((hh, 4, hh), f32)
    wrec = jnp.concatenate(
        [jnp.stack([wrf, z], axis=2).reshape(hh, G),
         jnp.stack([z, wrb], axis=2).reshape(hh, G)], axis=0).astype(f32)      # (2h, 8h)

    def padb(x):
        return jnp.pad(x, ((0, pad),) + ((0, 0),) * (x.ndim - 1)) if pad else x

    h0cat = padb(jnp.concatenate([p["h0"][0], p["h0"][1]], axis=-1).astype(f32))   # (B_pad, 2h)
    c0cat = padb(jnp.concatenate([p["c0"][0], p["c0"][1]], axis=-1).astype(f32))
    attw = padb(p["att_weight"].reshape(B, Hd).astype(f32))                        # (B_pad, 2h)
    rbias = padb(jnp.pad(p["rel_bias"].reshape(B, T).astype(f32),
                         ((0, 0), (0, TP - T))))                                   # (B_pad, TP)
    relT = jnp.pad(p["rel_table"].T.astype(f32), ((0, 0), (0, TP - T)))            # (2h, TP)
    emb_t = jnp.transpose(padb(emb.astype(f32)), (1, 0, 2))                        # (S, B_pad, D)

    grid = (B_pad // Bb,)

    def shared(shape):
        return pl.BlockSpec(shape, lambda i: (0,) * len(shape))

    kernel = functools.partial(_bilstm_attention_kernel, num_tags=T, matmul_dtype=matmul_dtype)

    # VMEM budget per program at Bb=128, S=8: emb 2x96 KiB + xg 512 KiB + lstm 128 KiB +
    # weights/bias/out < 1.5 MiB total -- far below the 32 MiB scoped default on v5e/v6e/v7x,
    # so no vmem_limit_bytes override is needed.  For much longer S, shrink block_batch.
    out = pl.pallas_call(
        kernel,
        out_shape=jax.ShapeDtypeStruct((B_pad, TP), f32),
        grid_spec=pltpu.PrefetchScalarGridSpec(
            num_scalar_prefetch=0,
            grid=grid,
            in_specs=[
                pl.BlockSpec((S, Bb, D), lambda i: (0, i, 0)),   # embeddings (seq-major chunk)
                shared((D, G)),                                  # fused input weights
                shared((1, G)),                                  # fused bias
                shared((Hd, G)),                                 # block-diag recurrent weights
                pl.BlockSpec((Bb, Hd), lambda i: (i, 0)),        # h0  [fwd|bwd]
                pl.BlockSpec((Bb, Hd), lambda i: (i, 0)),        # c0  [fwd|bwd]
                pl.BlockSpec((Bb, Hd), lambda i: (i, 0)),        # attention weight
                shared((Hd, TP)),                                # relation table^T (tag-padded)
                pl.BlockSpec((Bb, TP), lambda i: (i, 0)),        # relation bias (tag-padded)
            ],
            out_specs=pl.BlockSpec((Bb, TP), lambda i: (i, 0)),
            scratch_shapes=[
                pltpu.VMEM((S, Bb, G), f32),                     # input-gate contributions
                pltpu.VMEM((S, Bb, Hd), f32),                    # bi-LSTM outputs
            ],
        ),
        compiler_params=pltpu.CompilerParams(dimension_semantics=("parallel",)),
    )(emb_t, wcat, bcat, wrec, h0cat, c0cat, attw, relT, rbias)

    return out[:B, :T]


def ref_forward(emb, p, *, matmul_dtype=None):
    """Plain-JAX reference mirroring the PyTorch forward semantics.  If matmul_dtype is set,
    the LSTM input-projection operands are rounded to it (mirrors the kernel's bf16-operand /
    f32-accumulate MXU matmul); everything else is float32 at HIGHEST matmul precision."""
    B, S, D = emb.shape
    hh = p["whh_f"].shape[1]
    T = p["rel_table"].shape[0]
    f32 = jnp.float32
    HP = lax.Precision.HIGHEST

    def q(x):
        x = x.astype(f32)
        return x.astype(matmul_dtype).astype(f32) if matmul_dtype is not None else x

    emb_q = q(emb)

    def run_dir(wih, whh, bih, bhh, h, c, reverse):
        wih_q = q(wih)
        outs = [None] * S
        order = range(S - 1, -1, -1) if reverse else range(S)
        for t in order:
            g = (jnp.dot(emb_q[:, t, :], wih_q.T, precision=HP)
                 + jnp.dot(h, whh.T, precision=HP) + bih + bhh)
            i = jax.nn.sigmoid(g[:, :hh])
            f = jax.nn.sigmoid(g[:, hh:2 * hh])
            gg = jnp.tanh(g[:, 2 * hh:3 * hh])
            o = jax.nn.sigmoid(g[:, 3 * hh:])
            c = f * c + i * gg
            h = o * jnp.tanh(c)
            outs[t] = h
        return jnp.stack(outs, axis=1)                       # (B, S, hh)

    fwd = run_dir(p["wih_f"], p["whh_f"], p["bih_f"], p["bhh_f"], p["h0"][0], p["c0"][0], False)
    bwd = run_dir(p["wih_b"], p["whh_b"], p["bih_b"], p["bhh_b"], p["h0"][1], p["c0"][1], True)
    lstm_out = jnp.concatenate([fwd, bwd], axis=-1)          # (B, S, Hd)
    Hm = jnp.transpose(lstm_out, (0, 2, 1))                  # (B, Hd, S)
    M = jnp.tanh(Hm)
    a = jax.nn.softmax(jnp.einsum("bih,bhs->bis", p["att_weight"], M, precision=HP), axis=2)
    att = jnp.einsum("bhs,bsi->bhi", Hm, jnp.transpose(a, (0, 2, 1)), precision=HP)
    att_out = jnp.tanh(att)
    Hd = 2 * hh
    rel = jnp.broadcast_to(p["rel_table"][None], (B, T, Hd))
    res = jnp.einsum("bth,bhi->bti", rel, att_out, precision=HP) + p["rel_bias"]
    res = jax.nn.softmax(res, axis=1)
    return res.reshape(B, -1)


def _make_params(key, B, D, hh, Hd, T):
    ks = jax.random.split(key, 13)
    s = 0.1  # weight scale for LSTM params (deterministic synthetic init)
    return {
        "wih_f": s * jax.random.normal(ks[0], (4 * hh, D), jnp.float32),
        "whh_f": s * jax.random.normal(ks[1], (4 * hh, hh), jnp.float32),
        "bih_f": s * jax.random.normal(ks[2], (4 * hh,), jnp.float32),
        "bhh_f": s * jax.random.normal(ks[3], (4 * hh,), jnp.float32),
        "wih_b": s * jax.random.normal(ks[4], (4 * hh, D), jnp.float32),
        "whh_b": s * jax.random.normal(ks[5], (4 * hh, hh), jnp.float32),
        "bih_b": s * jax.random.normal(ks[6], (4 * hh,), jnp.float32),
        "bhh_b": s * jax.random.normal(ks[7], (4 * hh,), jnp.float32),
        "att_weight": jax.random.normal(ks[8], (B, 1, Hd), jnp.float32),
        "rel_bias": jax.random.normal(ks[9], (B, T, 1), jnp.float32),
        "h0": jax.random.normal(ks[10], (2, B, hh), jnp.float32),
        "c0": jax.random.normal(ks[11], (2, B, hh), jnp.float32),
        "rel_table": jax.random.normal(ks[12], (T, Hd), jnp.float32),
    }


if __name__ == "__main__":
    config = dict(BATCH=2, EMBEDDING_SIZE=100, EMBEDDING_DIM=16,
                  HIDDEN_DIM=32, TAG_SIZE=12, POS_SIZE=20, POS_DIM=4)
    S = 8
    E, Hd, T = config["EMBEDDING_DIM"], config["HIDDEN_DIM"], config["TAG_SIZE"]
    Pd, V, P = config["POS_DIM"], config["EMBEDDING_SIZE"], config["POS_SIZE"]
    hh = Hd // 2
    D = E + 2 * Pd

    key = jax.random.PRNGKey(0)
    k_emb, k_par, k_idx, k_par2, k_idx2 = jax.random.split(key, 5)

    # Embedding tables + lookups (glue, plain JAX — same role as nn.Embedding in the module).
    ke = jax.random.split(k_emb, 3)
    word_tbl = jax.random.normal(ke[0], (V, E), jnp.float32)
    pos1_tbl = jax.random.normal(ke[1], (P, Pd), jnp.float32)
    pos2_tbl = jax.random.normal(ke[2], (P, Pd), jnp.float32)

    def make_inputs(kidx, B):
        ki = jax.random.split(kidx, 3)
        sentence = jax.random.randint(ki[0], (B, S), 0, V)
        _pos1 = jax.random.randint(ki[1], (B, S), 0, P)   # unused: original forward uses pos2 twice
        pos2 = jax.random.randint(ki[2], (B, S), 0, P)
        # Bug preserved from the PyTorch forward: pos2 indexes BOTH position embeddings.
        return jnp.concatenate(
            [word_tbl[sentence], pos1_tbl[pos2], pos2_tbl[pos2]], axis=-1).astype(jnp.float32)

    def check(B, k_p, k_i, name):
        params = _make_params(k_p, B, D, hh, Hd, T)
        emb = make_inputs(k_i, B)
        out = jax.block_until_ready(bilstm_attention_forward(emb, params))
        assert out.shape == (B, T), (name, out.shape)
        # exact tag-softmax divide -> rows sum to 1 tightly
        assert bool(jnp.allclose(jnp.sum(out, axis=-1), 1.0, atol=1e-5)), name
        # tight check vs a reference that mirrors the kernel's bf16 matmul-operand rounding
        ref_q = ref_forward(emb, params, matmul_dtype=jnp.bfloat16)
        assert bool(jnp.allclose(out, ref_q, atol=2e-3, rtol=2e-3)), (name, out, ref_q)
        # looser sanity check vs the pure-float32 reference (bf16 input-projection quantization)
        ref_f = ref_forward(emb, params)
        assert bool(jnp.allclose(out, ref_f, atol=2e-2, rtol=2e-2)), (name, out, ref_f)

    # module-sized case (BATCH=2): single 8-row batch chunk, one grid program
    check(config["BATCH"], k_par, k_idx, "batch2")
    # larger batch exercises wider batch chunks + multi-program grid (Bb=24, 2 programs)
    check(48, k_par2, k_idx2, "batch48")

    print("KERNEL_OK")
</pallas_src>

<mosaic_0001>
module attributes {stable_mosaic.version = 11 : i64} {
  func.func @_bilstm_attention_kernel(%arg0: i32, %arg1: memref<8x8x24xf32, #tpu.memory_space<vmem>>, %arg2: memref<24x128xbf16, #tpu.memory_space<vmem>>, %arg3: memref<1x128xf32, #tpu.memory_space<vmem>>, %arg4: memref<32x128xf32, #tpu.memory_space<vmem>>, %arg5: memref<8x32xf32, #tpu.memory_space<vmem>>, %arg6: memref<8x32xf32, #tpu.memory_space<vmem>>, %arg7: memref<8x32xf32, #tpu.memory_space<vmem>>, %arg8: memref<32x128xf32, #tpu.memory_space<vmem>>, %arg9: memref<8x128xf32, #tpu.memory_space<vmem>>, %arg10: memref<8x128xf32, #tpu.memory_space<vmem>>, %arg11: memref<8x8x128xf32, #tpu.memory_space<vmem>>, %arg12: memref<8x8x32xf32, #tpu.memory_space<vmem>>) attributes {dimension_semantics = [#tpu.dimension_semantics<parallel>], iteration_bounds = array<i64: 1>, scalar_prefetch = 0 : i64, scratch_operands = 2 : i64, tpu.core_type = #tpu.core_type<tc>, window_params = [{transform_indices = @transform_0, window_bounds = array<i64: 8, 8, 24>}, {pipeline_mode = #tpu.pipeline_mode<synchronous>, transform_indices = @transform_1, window_bounds = array<i64: 24, 128>}, {pipeline_mode = #tpu.pipeline_mode<synchronous>, transform_indices = @transform_2, window_bounds = array<i64: 1, 128>}, {pipeline_mode = #tpu.pipeline_mode<synchronous>, transform_indices = @transform_3, window_bounds = array<i64: 32, 128>}, {transform_indices = @transform_4, window_bounds = array<i64: 8, 32>}, {transform_indices = @transform_5, window_bounds = array<i64: 8, 32>}, {transform_indices = @transform_6, window_bounds = array<i64: 8, 32>}, {pipeline_mode = #tpu.pipeline_mode<synchronous>, transform_indices = @transform_7, window_bounds = array<i64: 32, 128>}, {transform_indices = @transform_8, window_bounds = array<i64: 8, 128>}, {transform_indices = @transform_9, window_bounds = array<i64: 8, 128>}]} {
    %c0 = arith.constant 0 : index
    %c0_0 = arith.constant 0 : index
    %c0_1 = arith.constant 0 : index
    %0 = vector.load %arg1[%c0, %c0_0, %c0_1] : memref<8x8x24xf32, #tpu.memory_space<vmem>>, vector<8x8x24xf32>
    %1 = vector.shape_cast %0 : vector<8x8x24xf32> to vector<64x24xf32>
    %2 = arith.truncf %1 : vector<64x24xf32> to vector<64x24xbf16>
    %c0_2 = arith.constant 0 : index
    %c0_3 = arith.constant 0 : index
    %3 = vector.load %arg2[%c0_2, %c0_3] : memref<24x128xbf16, #tpu.memory_space<vmem>>, vector<24x128xbf16>
    %cst = arith.constant dense<0.000000e+00> : vector<64x128xf32>
    %4 = tpu.matmul %2, %3, %cst {dimension_numbers = #tpu.dot_dimension_numbers<[1], [0], [0], [1], [0, 0, 1, 1], [], []>} : vector<64x24xbf16>, vector<24x128xbf16>, vector<64x128xf32> -> vector<64x128xf32>
    %c0_4 = arith.constant 0 : index
    %c0_5 = arith.constant 0 : index
    %5 = vector.load %arg3[%c0_4, %c0_5] : memref<1x128xf32, #tpu.memory_space<vmem>>, vector<1x128xf32>
    %6 = vector.broadcast %5 : vector<1x128xf32> to vector<64x128xf32>
    %7 = arith.addf %4, %6 : vector<64x128xf32>
    %8 = vector.shape_cast %7 : vector<64x128xf32> to vector<8x8x128xf32>
    %c0_6 = arith.constant 0 : index
    %c0_7 = arith.constant 0 : index
    %c0_8 = arith.constant 0 : index
    %9 = vector.load %arg11[%c0_6, %c0_7, %c0_8] : memref<8x8x128xf32, #tpu.memory_space<vmem>>, vector<8x8x128xf32>
    tpu.vector_store %arg11[%c0_6, %c0_7, %c0_8], %8 {strides = array<i32>} : memref<8x8x128xf32, #tpu.memory_space<vmem>>, vector<8x8x128xf32>,
    %10 = tpu.iota {dimensions = array<i32: 1>} : vector<8x128xi32>
    %c32_i32 = arith.constant 32 : i32
    %c0_i32 = arith.constant 0 : i32
    %11 = arith.cmpi eq, %c32_i32, %c0_i32 : i32
    %c1_i32 = arith.constant 1 : i32
    %12 = arith.select %11, %c1_i32, %c32_i32 : i32
    %13 = vector.broadcast %12 : i32 to vector<8x128xi32>
    %14 = arith.remsi %10, %13 : vector<8x128xi32>
    %c0_i32_9 = arith.constant 0 : i32
    %15 = vector.broadcast %c0_i32_9 : i32 to vector<8x128xi32>
    %16 = arith.cmpi ne, %14, %15 : vector<8x128xi32>
    %c0_i32_10 = arith.constant 0 : i32
    %17 = vector.broadcast %c0_i32_10 : i32 to vector<8x128xi32>
    %18 = arith.cmpi slt, %14, %17 : vector<8x128xi32>
    %c0_i32_11 = arith.constant 0 : i32
    %19 = arith.cmpi slt, %12, %c0_i32_11 : i32
    %20 = vector.broadcast %19 : i1 to vector<8x128xi1>
    %21 = vector.broadcast %20 : vector<8x128xi1> to vector<8x128xi1>
    %22 = arith.xori %18, %21 : vector<8x128xi1>
    %23 = arith.andi %22, %16 : vector<8x128xi1>
    %24 = vector.broadcast %12 : i32 to vector<8x128xi32>
    %25 = arith.addi %14, %24 : vector<8x128xi32>
    %26 = arith.select %23, %25, %14 : vector<8x128xi1>, vector<8x128xi32>
    %c16_i32 = arith.constant 16 : i32
    %27 = vector.broadcast %c16_i32 : i32 to vector<8x128xi32>
    %28 = arith.cmpi slt, %26, %27 : vector<8x128xi32>
    %c0_12 = arith.constant 0 : index
    %c0_13 = arith.constant 0 : index
    %c0_14 = arith.constant 0 : index
    %29 = vector.load %arg11[%c0_12, %c0_13, %c0_14] : memref<8x8x128xf32, #tpu.memory_space<vmem>>, vector<1x8x128xf32>
    %30 = vector.shape_cast %29 : vector<1x8x128xf32> to vector<8x128xf32>
    %c7 = arith.constant 7 : index
    %c0_15 = arith.constant 0 : index
    %c0_16 = arith.constant 0 : index
    %31 = vector.load %arg11[%c7, %c0_15, %c0_16] : memref<8x8x128xf32, #tpu.memory_space<vmem>>, vector<1x8x128xf32>
    %32 = vector.shape_cast %31 : vector<1x8x128xf32> to vector<8x128xf32>
    %33 = arith.select %28, %30, %32 : vector<8x128xi1>, vector<8x128xf32>
    %c0_17 = arith.constant 0 : index
    %c0_18 = arith.constant 0 : index
    %c0_19 = arith.constant 0 : index
    %34 = vector.load %arg11[%c0_17, %c0_18, %c0_19] : memref<8x8x128xf32, #tpu.memory_space<vmem>>, vector<1x8x128xf32>
    %35 = vector.shape_cast %34 : vector<1x8x128xf32> to vector<8x128xf32>
    %36 = vector.shape_cast %33 : vector<8x128xf32> to vector<1x8x128xf32>
    tpu.vector_store %arg11[%c0_17, %c0_18, %c0_19], %36 {strides = array<i32>} : memref<8x8x128xf32, #tpu.memory_space<vmem>>, vector<1x8x128xf32>,
    %37 = arith.select %28, %32, %30 : vector<8x128xi1>, vector<8x128xf32>
    %c7_20 = arith.constant 7 : index
    %c0_21 = arith.constant 0 : index
    %c0_22 = arith.constant 0 : index
    %38 = vector.load %arg11[%c7_20, %c0_21, %c0_22] : memref<8x8x128xf32, #tpu.memory_space<vmem>>, vector<1x8x128xf32>
    %39 = vector.shape_cast %38 : vector<1x8x128xf32> to vector<8x128xf32>
    %40 = vector.shape_cast %37 : vector<8x128xf32> to vector<1x8x128xf32>
    tpu.vector_store %arg11[%c7_20, %c0_21, %c0_22], %40 {strides = array<i32>} : memref<8x8x128xf32, #tpu.memory_space<vmem>>, vector<1x8x128xf32>,
    %c1 = arith.constant 1 : index
    %c0_23 = arith.constant 0 : index
    %c0_24 = arith.constant 0 : index
    %41 = vector.load %arg11[%c1, %c0_23, %c0_24] : memref<8x8x128xf32, #tpu.memory_space<vmem>>, vector<1x8x128xf32>
    %42 = vector.shape_cast %41 : vector<1x8x128xf32> to vector<8x128xf32>
    %c6 = arith.constant 6 : index
    %c0_25 = arith.constant 0 : index
    %c0_26 = arith.constant 0 : index
    %43 = vector.load %arg11[%c6, %c0_25, %c0_26] : memref<8x8x128xf32, #tpu.memory_space<vmem>>, vector<1x8x128xf32>
    %44 = vector.shape_cast %43 : vector<1x8x128xf32> to vector<8x128xf32>
    %45 = arith.select %28, %42, %44 : vector<8x128xi1>, vector<8x128xf32>
    %c1_27 = arith.constant 1 : index
    %c0_28 = arith.constant 0 : index
    %c0_29 = arith.constant 0 : index
    %46 = vector.load %arg11[%c1_27, %c0_28, %c0_29] : memref<8x8x128xf32, #tpu.memory_space<vmem>>, vector<1x8x128xf32>
    %47 = vector.shape_cast %46 : vector<1x8x128xf32> to vector<8x128xf32>
    %48 = vector.shape_cast %45 : vector<8x128xf32> to vector<1x8x128xf32>
    tpu.vector_store %arg11[%c1_27, %c0_28, %c0_29], %48 {strides = array<i32>} : memref<8x8x128xf32, #tpu.memory_space<vmem>>, vector<1x8x128xf32>,
    %49 = arith.select %28, %44, %42 : vector<8x128xi1>, vector<8x128xf32>
    %c6_30 = arith.constant 6 : index
    %c0_31 = arith.constant 0 : index
    %c0_32 = arith.constant 0 : index
    %50 = vector.load %arg11[%c6_30, %c0_31, %c0_32] : memref<8x8x128xf32, #tpu.memory_space<vmem>>, vector<1x8x128xf32>
    %51 = vector.shape_cast %50 : vector<1x8x128xf32> to vector<8x128xf32>
    %52 = vector.shape_cast %49 : vector<8x128xf32> to vector<1x8x128xf32>
    tpu.vector_store %arg11[%c6_30, %c0_31, %c0_32], %52 {strides = array<i32>} : memref<8x8x128xf32, #tpu.memory_space<vmem>>, vector<1x8x128xf32>,
    %c2 = arith.constant 2 : index
    %c0_33 = arith.constant 0 : index
    %c0_34 = arith.constant 0 : index
    %53 = vector.load %arg11[%c2, %c0_33, %c0_34] : memref<8x8x128xf32, #tpu.memory_space<vmem>>, vector<1x8x128xf32>
    %54 = vector.shape_cast %53 : vector<1x8x128xf32> to vector<8x128xf32>
    %c5 = arith.constant 5 : index
    %c0_35 = arith.constant 0 : index
    %c0_36 = arith.constant 0 : index
    %55 = vector.load %arg11[%c5, %c0_35, %c0_36] : memref<8x8x128xf32, #tpu.memory_space<vmem>>, vector<1x8x128xf32>
    %56 = vector.shape_cast %55 : vector<1x8x128xf32> to vector<8x128xf32>
    %57 = arith.select %28, %54, %56 : vector<8x128xi1>, vector<8x128xf32>
    %c2_37 = arith.constant 2 : index
    %c0_38 = arith.constant 0 : index
    %c0_39 = arith.constant 0 : index
    %58 = vector.load %arg11[%c2_37, %c0_38, %c0_39] : memref<8x8x128xf32, #tpu.memory_space<vmem>>, vector<1x8x128xf32>
    %59 = vector.shape_cast %58 : vector<1x8x128xf32> to vector<8x128xf32>
    %60 = vector.shape_cast %57 : vector<8x128xf32> to vector<1x8x128xf32>
    tpu.vector_store %arg11[%c2_37, %c0_38, %c0_39], %60 {strides = array<i32>} : memref<8x8x128xf32, #tpu.memory_space<vmem>>, vector<1x8x128xf32>,
    %61 = arith.select %28, %56, %54 : vector<8x128xi1>, vector<8x128xf32>
    %c5_40 = arith.constant 5 : index
    %c0_41 = arith.constant 0 : index
    %c0_42 = arith.constant 0 : index
    %62 = vector.load %arg11[%c5_40, %c0_41, %c0_42] : memref<8x8x128xf32, #tpu.memory_space<vmem>>, vector<1x8x128xf32>
    %63 = vector.shape_cast %62 : vector<1x8x128xf32> to vector<8x128xf32>
    %64 = vector.shape_cast %61 : vector<8x128xf32> to vector<1x8x128xf32>
    tpu.vector_store %arg11[%c5_40, %c0_41, %c0_42], %64 {strides = array<i32>} : memref<8x8x128xf32, #tpu.memory_space<vmem>>, vector<1x8x128xf32>,
    %c3 = arith.constant 3 : index
    %c0_43 = arith.constant 0 : index
    %c0_44 = arith.constant 0 : index
    %65 = vector.load %arg11[%c3, %c0_43, %c0_44] : memref<8x8x128xf32, #tpu.memory_space<vmem>>, vector<1x8x128xf32>
    %66 = vector.shape_cast %65 : vector<1x8x128xf32> to vector<8x128xf32>
    %c4 = arith.constant 4 : index
    %c0_45 = arith.constant 0 : index
    %c0_46 = arith.constant 0 : index
    %67 = vector.load %arg11[%c4, %c0_45, %c0_46] : memref<8x8x128xf32, #tpu.memory_space<vmem>>, vector<1x8x128xf32>
    %68 = vector.shape_cast %67 : vector<1x8x128xf32> to vector<8x128xf32>
    %69 = arith.select %28, %66, %68 : vector<8x128xi1>, vector<8x128xf32>
    %c3_47 = arith.constant 3 : index
    %c0_48 = arith.constant 0 : index
    %c0_49 = arith.constant 0 : index
    %70 = vector.load %arg11[%c3_47, %c0_48, %c0_49] : memref<8x8x128xf32, #tpu.memory_space<vmem>>, vector<1x8x128xf32>
    %71 = vector.shape_cast %70 : vector<1x8x128xf32> to vector<8x128xf32>
    %72 = vector.shape_cast %69 : vector<8x128xf32> to vector<1x8x128xf32>
    tpu.vector_store %arg11[%c3_47, %c0_48, %c0_49], %72 {strides = array<i32>} : memref<8x8x128xf32, #tpu.memory_space<vmem>>, vector<1x8x128xf32>,
    %73 = arith.select %28, %68, %66 : vector<8x128xi1>, vector<8x128xf32>
    %c4_50 = arith.constant 4 : index
    %c0_51 = arith.constant 0 : index
    %c0_52 = arith.constant 0 : index
    %74 = vector.load %arg11[%c4_50, %c0_51, %c0_52] : memref<8x8x128xf32, #tpu.memory_space<vmem>>, vector<1x8x128xf32>
    %75 = vector.shape_cast %74 : vector<1x8x128xf32> to vector<8x128xf32>
    %76 = vector.shape_cast %73 : vector<8x128xf32> to vector<1x8x128xf32>
    tpu.vector_store %arg11[%c4_50, %c0_51, %c0_52], %76 {strides = array<i32>} : memref<8x8x128xf32, #tpu.memory_space<vmem>>, vector<1x8x128xf32>,
    %c0_53 = arith.constant 0 : index
    %c0_54 = arith.constant 0 : index
    %77 = vector.load %arg4[%c0_53, %c0_54] : memref<32x128xf32, #tpu.memory_space<vmem>>, vector<32x128xf32>
    %c0_55 = arith.constant 0 : index
    %c0_56 = arith.constant 0 : index
    %78 = vector.load %arg5[%c0_55, %c0_56] : memref<8x32xf32, #tpu.memory_space<vmem>>, vector<8x32xf32>
    %c0_57 = arith.constant 0 : index
    %c0_58 = arith.constant 0 : index
    %79 = vector.load %arg6[%c0_57, %c0_58] : memref<8x32xf32, #tpu.memory_space<vmem>>, vector<8x32xf32>
    %c0_i32_59 = arith.constant 0 : i32
    %80 = arith.index_cast %c0_i32_59 : i32 to index
    %c0_60 = arith.constant 0 : index
    %c0_61 = arith.constant 0 : index
    %81 = vector.load %arg11[%80, %c0_60, %c0_61] : memref<8x8x128xf32, #tpu.memory_space<vmem>>, vector<1x8x128xf32>
    %82 = vector.shape_cast %81 : vector<1x8x128xf32> to vector<8x128xf32>
    %cst_62 = arith.constant dense<0.000000e+00> : vector<8x128xf32>
    %83 = tpu.matmul %78, %77, %cst_62 {dimension_numbers = #tpu.dot_dimension_numbers<[1], [0], [0], [1], [0, 0, 1, 1], [], []>} : vector<8x32xf32>, vector<32x128xf32>, vector<8x128xf32> -> vector<8x128xf32>
    %84 = arith.addf %82, %83 : vector<8x128xf32>
    %85 = vector.extract_strided_slice %84 {offsets = [0, 0], sizes = [8, 96], strides = [1, 1]} : vector<8x128xf32> to vector<8x96xf32>
    %86 = arith.negf %85 : vector<8x96xf32>
    %87 = math.exp %86 : vector<8x96xf32>
    %cst_63 = arith.constant 1.000000e+00 : f32
    %88 = vector.broadcast %cst_63 : f32 to vector<8x96xf32>
    %89 = arith.addf %88, %87 : vector<8x96xf32>
    %90 = arith.divf %88, %89 : vector<8x96xf32>
    %91 = vector.extract_strided_slice %90 {offsets = [0, 0], sizes = [8, 32], strides = [1, 1]} : vector<8x96xf32> to vector<8x32xf32>
    %92 = vector.extract_strided_slice %90 {offsets = [0, 32], sizes = [8, 32], strides = [1, 1]} : vector<8x96xf32> to vector<8x32xf32>
    %93 = vector.extract_strided_slice %90 {offsets = [0, 64], sizes = [8, 32], strides = [1, 1]} : vector<8x96xf32> to vector<8x32xf32>
    %94 = vector.extract_strided_slice %84 {offsets = [0, 96], sizes = [8, 32], strides = [1, 1]} : vector<8x128xf32> to vector<8x32xf32>
    %95 = math.tanh %94 : vector<8x32xf32>
    %96 = arith.mulf %92, %79 : vector<8x32xf32>
    %97 = arith.mulf %91, %95 : vector<8x32xf32>
    %98 = arith.addf %96, %97 : vector<8x32xf32>
    %99 = math.tanh %98 : vector<8x32xf32>
    %100 = arith.mulf %93, %99 : vector<8x32xf32>
    %101 = vector.shape_cast %100 : vector<8x32xf32> to vector<1x8x32xf32>
    %102 = arith.index_cast %c0_i32_59 : i32 to index
    %c0_64 = arith.constant 0 : index
    %c0_65 = arith.constant 0 : index
    %103 = vector.load %arg12[%102, %c0_64, %c0_65] : memref<8x8x32xf32, #tpu.memory_space<vmem>>, vector<1x8x32xf32>
    tpu.vector_store %arg12[%102, %c0_64, %c0_65], %101 {strides = array<i32>} : memref<8x8x32xf32, #tpu.memory_space<vmem>>, vector<1x8x32xf32>,
    %c1_i32_66 = arith.constant 1 : i32
    %104 = arith.index_cast %c1_i32_66 : i32 to index
    %c0_67 = arith.constant 0 : index
    %c0_68 = arith.constant 0 : index
    %105 = vector.load %arg11[%104, %c0_67, %c0_68] : memref<8x8x128xf32, #tpu.memory_space<vmem>>, vector<1x8x128xf32>
    %106 = vector.shape_cast %105 : vector<1x8x128xf32> to vector<8x128xf32>
    %cst_69 = arith.constant dense<0.000000e+00> : vector<8x128xf32>
    %107 = tpu.matmul %100, %77, %cst_69 {dimension_numbers = #tpu.dot_dimension_numbers<[1], [0], [0], [1], [0, 0, 1, 1], [], []>} : vector<8x32xf32>, vector<32x128xf32>, vector<8x128xf32> -> vector<8x128xf32>
    %108 = arith.addf %106, %107 : vector<8x128xf32>
    %109 = vector.extract_strided_slice %108 {offsets = [0, 0], sizes = [8, 96], strides = [1, 1]} : vector<8x128xf32> to vector<8x96xf32>
    %110 = arith.negf %109 : vector<8x96xf32>
    %111 = math.exp %110 : vector<8x96xf32>
    %cst_70 = arith.constant 1.000000e+00 : f32
    %112 = vector.broadcast %cst_70 : f32 to vector<8x96xf32>
    %113 = arith.addf %112, %111 : vector<8x96xf32>
    %114 = arith.divf %112, %113 : vector<8x96xf32>
    %115 = vector.extract_strided_slice %114 {offsets = [0, 0], sizes = [8, 32], strides = [1, 1]} : vector<8x96xf32> to vector<8x32xf32>
    %116 = vector.extract_strided_slice %114 {offsets = [0, 32], sizes = [8, 32], strides = [1, 1]} : vector<8x96xf32> to vector<8x32xf32>
    %117 = vector.extract_strided_slice %114 {offsets = [0, 64], sizes = [8, 32], strides = [1, 1]} : vector<8x96xf32> to vector<8x32xf32>
    %118 = vector.extract_strided_slice %108 {offsets = [0, 96], sizes = [8, 32], strides = [1, 1]} : vector<8x128xf32> to vector<8x32xf32>
    %119 = math.tanh %118 : vector<8x32xf32>
    %120 = arith.mulf %116, %98 : vector<8x32xf32>
    %121 = arith.mulf %115, %119 : vector<8x32xf32>
    %122 = arith.addf %120, %121 : vector<8x32xf32>
    %123 = math.tanh %122 : vector<8x32xf32>
    %124 = arith.mulf %117, %123 : vector<8x32xf32>
    %125 = vector.shape_cast %124 : vector<8x32xf32> to vector<1x8x32xf32>
    %126 = arith.index_cast %c1_i32_66 : i32 to index
    %c0_71 = arith.constant 0 : index
    %c0_72 = arith.constant 0 : index
    %127 = vector.load %arg12[%126, %c0_71, %c0_72] : memref<8x8x32xf32, #tpu.memory_space<vmem>>, vector<1x8x32xf32>
    tpu.vector_store %arg12[%126, %c0_71, %c0_72], %125 {strides = array<i32>} : memref<8x8x32xf32, #tpu.memory_space<vmem>>, vector<1x8x32xf32>,
    %c2_i32 = arith.constant 2 : i32
    %128 = arith.index_cast %c2_i32 : i32 to index
    %c0_73 = arith.constant 0 : index
    %c0_74 = arith.constant 0 : index
    %129 = vector.load %arg11[%128, %c0_73, %c0_74] : memref<8x8x128xf32, #tpu.memory_space<vmem>>, vector<1x8x128xf32>
    %130 = vector.shape_cast %129 : vector<1x8x128xf32> to vector<8x128xf32>
    %cst_75 = arith.constant dense<0.000000e+00> : vector<8x128xf32>
    %131 = tpu.matmul %124, %77, %cst_75 {dimension_numbers = #tpu.dot_dimension_numbers<[1], [0], [0], [1], [0, 0, 1, 1], [], []>} : vector<8x32xf32>, vector<32x128xf32>, vector<8x128xf32> -> vector<8x128xf32>
    %132 = arith.addf %130, %131 : vector<8x128xf32>
    %133 = vector.extract_strided_slice %132 {offsets = [0, 0], sizes = [8, 96], strides = [1, 1]} : vector<8x128xf32> to vector<8x96xf32>
    %134 = arith.negf %133 : vector<8x96xf32>
    %135 = math.exp %134 : vector<8x96xf32>
    %cst_76 = arith.constant 1.000000e+00 : f32
    %136 = vector.broadcast %cst_76 : f32 to vector<8x96xf32>
    %137 = arith.addf %136, %135 : vector<8x96xf32>
    %138 = arith.divf %136, %137 : vector<8x96xf32>
    %139 = vector.extract_strided_slice %138 {offsets = [0, 0], sizes = [8, 32], strides = [1, 1]} : vector<8x96xf32> to vector<8x32xf32>
    %140 = vector.extract_strided_slice %138 {offsets = [0, 32], sizes = [8, 32], strides = [1, 1]} : vector<8x96xf32> to vector<8x32xf32>
    %141 = vector.extract_strided_slice %138 {offsets = [0, 64], sizes = [8, 32], strides = [1, 1]} : vector<8x96xf32> to vector<8x32xf32>
    %142 = vector.extract_strided_slice %132 {offsets = [0, 96], sizes = [8, 32], strides = [1, 1]} : vector<8x128xf32> to vector<8x32xf32>
    %143 = math.tanh %142 : vector<8x32xf32>
    %144 = arith.mulf %140, %122 : vector<8x32xf32>
    %145 = arith.mulf %139, %143 : vector<8x32xf32>
    %146 = arith.addf %144, %145 : vector<8x32xf32>
    %147 = math.tanh %146 : vector<8x32xf32>
    %148 = arith.mulf %141, %147 : vector<8x32xf32>
    %149 = vector.shape_cast %148 : vector<8x32xf32> to vector<1x8x32xf32>
    %150 = arith.index_cast %c2_i32 : i32 to index
    %c0_77 = arith.constant 0 : index
    %c0_78 = arith.constant 0 : index
    %151 = vector.load %arg12[%150, %c0_77, %c0_78] : memref<8x8x32xf32, #tpu.memory_space<vmem>>, vector<1x8x32xf32>
    tpu.vector_store %arg12[%150, %c0_77, %c0_78], %149 {strides = array<i32>} : memref<8x8x32xf32, #tpu.memory_space<vmem>>, vector<1x8x32xf32>,
    %c3_i32 = arith.constant 3 : i32
    %152 = arith.index_cast %c3_i32 : i32 to index
    %c0_79 = arith.constant 0 : index
    %c0_80 = arith.constant 0 : index
    %153 = vector.load %arg11[%152, %c0_79, %c0_80] : memref<8x8x128xf32, #tpu.memory_space<vmem>>, vector<1x8x128xf32>
    %154 = vector.shape_cast %153 : vector<1x8x128xf32> to vector<8x128xf32>
    %cst_81 = arith.constant dense<0.000000e+00> : vector<8x128xf32>
    %155 = tpu.matmul %148, %77, %cst_81 {dimension_numbers = #tpu.dot_dimension_numbers<[1], [0], [0], [1], [0, 0, 1, 1], [], []>} : vector<8x32xf32>, vector<32x128xf32>, vector<8x128xf32> -> vector<8x128xf32>
    %156 = arith.addf %154, %155 : vector<8x128xf32>
    %157 = vector.extract_strided_slice %156 {offsets = [0, 0], sizes = [8, 96], strides = [1, 1]} : vector<8x128xf32> to vector<8x96xf32>
    %158 = arith.negf %157 : vector<8x96xf32>
    %159 = math.exp %158 : vector<8x96xf32>
    %cst_82 = arith.constant 1.000000e+00 : f32
    %160 = vector.broadcast %cst_82 : f32 to vector<8x96xf32>
    %161 = arith.addf %160, %159 : vector<8x96xf32>
    %162 = arith.divf %160, %161 : vector<8x96xf32>
    %163 = vector.extract_strided_slice %162 {offsets = [0, 0], sizes = [8, 32], strides = [1, 1]} : vector<8x96xf32> to vector<8x32xf32>
    %164 = vector.extract_strided_slice %162 {offsets = [0, 32], sizes = [8, 32], strides = [1, 1]} : vector<8x96xf32> to vector<8x32xf32>
    %165 = vector.extract_strided_slice %162 {offsets = [0, 64], sizes = [8, 32], strides = [1, 1]} : vector<8x96xf32> to vector<8x32xf32>
    %166 = vector.extract_strided_slice %156 {offsets = [0, 96], sizes = [8, 32], strides = [1, 1]} : vector<8x128xf32> to vector<8x32xf32>
    %167 = math.tanh %166 : vector<8x32xf32>
    %168 = arith.mulf %164, %146 : vector<8x32xf32>
    %169 = arith.mulf %163, %167 : vector<8x32xf32>
    %170 = arith.addf %168, %169 : vector<8x32xf32>
    %171 = math.tanh %170 : vector<8x32xf32>
    %172 = arith.mulf %165, %171 : vector<8x32xf32>
    %173 = vector.shape_cast %172 : vector<8x32xf32> to vector<1x8x32xf32>
    %174 = arith.index_cast %c3_i32 : i32 to index
    %c0_83 = arith.constant 0 : index
    %c0_84 = arith.constant 0 : index
    %175 = vector.load %arg12[%174, %c0_83, %c0_84] : memref<8x8x32xf32, #tpu.memory_space<vmem>>, vector<1x8x32xf32>
    tpu.vector_store %arg12[%174, %c0_83, %c0_84], %173 {strides = array<i32>} : memref<8x8x32xf32, #tpu.memory_space<vmem>>, vector<1x8x32xf32>,
    %c4_i32 = arith.constant 4 : i32
    %176 = arith.index_cast %c4_i32 : i32 to index
    %c0_85 = arith.constant 0 : index
    %c0_86 = arith.constant 0 : index
    %177 = vector.load %arg11[%176, %c0_85, %c0_86] : memref<8x8x128xf32, #tpu.memory_space<vmem>>, vector<1x8x128xf32>
    %178 = vector.shape_cast %177 : vector<1x8x128xf32> to vector<8x128xf32>
    %cst_87 = arith.constant dense<0.000000e+00> : vector<8x128xf32>
    %179 = tpu.matmul %172, %77, %cst_87 {dimension_numbers = #tpu.dot_dimension_numbers<[1], [0], [0], [1], [0, 0, 1, 1], [], []>} : vector<8x32xf32>, vector<32x128xf32>, vector<8x128xf32> -> vector<8x128xf32>
    %180 = arith.addf %178, %179 : vector<8x128xf32>
    %181 = vector.extract_strided_slice %180 {offsets = [0, 0], sizes = [8, 96], strides = [1, 1]} : vector<8x128xf32> to vector<8x96xf32>
    %182 = arith.negf %181 : vector<8x96xf32>
    %183 = math.exp %182 : vector<8x96xf32>
    %cst_88 = arith.constant 1.000000e+00 : f32
    %184 = vector.broadcast %cst_88 : f32 to vector<8x96xf32>
    %185 = arith.addf %184, %183 : vector<8x96xf32>
    %186 = arith.divf %184, %185 : vector<8x96xf32>
    %187 = vector.extract_strided_slice %186 {offsets = [0, 0], sizes = [8, 32], strides = [1, 1]} : vector<8x96xf32> to vector<8x32xf32>
    %188 = vector.extract_strided_slice %186 {offsets = [0, 32], sizes = [8, 32], strides = [1, 1]} : vector<8x96xf32> to vector<8x32xf32>
    %189 = vector.extract_strided_slice %186 {offsets = [0, 64], sizes = [8, 32], strides = [1, 1]} : vector<8x96xf32> to vector<8x32xf32>
    %190 = vector.extract_strided_slice %180 {offsets = [0, 96], sizes = [8, 32], strides = [1, 1]} : vector<8x128xf32> to vector<8x32xf32>
    %191 = math.tanh %190 : vector<8x32xf32>
    %192 = arith.mulf %188, %170 : vector<8x32xf32>
    %193 = arith.mulf %187, %191 : vector<8x32xf32>
    %194 = arith.addf %192, %193 : vector<8x32xf32>
    %195 = math.tanh %194 : vector<8x32xf32>
    %196 = arith.mulf %189, %195 : vector<8x32xf32>
    %197 = vector.shape_cast %196 : vector<8x32xf32> to vector<1x8x32xf32>
    %198 = arith.index_cast %c4_i32 : i32 to index
    %c0_89 = arith.constant 0 : index
    %c0_90 = arith.constant 0 : index
    %199 = vector.load %arg12[%198, %c0_89, %c0_90] : memref<8x8x32xf32, #tpu.memory_space<vmem>>, vector<1x8x32xf32>
    tpu.vector_store %arg12[%198, %c0_89, %c0_90], %197 {strides = array<i32>} : memref<8x8x32xf32, #tpu.memory_space<vmem>>, vector<1x8x32xf32>,
    %c5_i32 = arith.constant 5 : i32
    %200 = arith.index_cast %c5_i32 : i32 to index
    %c0_91 = arith.constant 0 : index
    %c0_92 = arith.constant 0 : index
    %201 = vector.load %arg11[%200, %c0_91, %c0_92] : memref<8x8x128xf32, #tpu.memory_space<vmem>>, vector<1x8x128xf32>
    %202 = vector.shape_cast %201 : vector<1x8x128xf32> to vector<8x128xf32>
    %cst_93 = arith.constant dense<0.000000e+00> : vector<8x128xf32>
    %203 = tpu.matmul %196, %77, %cst_93 {dimension_numbers = #tpu.dot_dimension_numbers<[1], [0], [0], [1], [0, 0, 1, 1], [], []>} : vector<8x32xf32>, vector<32x128xf32>, vector<8x128xf32> -> vector<8x128xf32>
    %204 = arith.addf %202, %203 : vector<8x128xf32>
    %205 = vector.extract_strided_slice %204 {offsets = [0, 0], sizes = [8, 96], strides = [1, 1]} : vector<8x128xf32> to vector<8x96xf32>
    %206 = arith.negf %205 : vector<8x96xf32>
    %207 = math.exp %206 : vector<8x96xf32>
    %cst_94 = arith.constant 1.000000e+00 : f32
    %208 = vector.broadcast %cst_94 : f32 to vector<8x96xf32>
    %209 = arith.addf %208, %207 : vector<8x96xf32>
    %210 = arith.divf %208, %209 : vector<8x96xf32>
    %211 = vector.extract_strided_slice %210 {offsets = [0, 0], sizes = [8, 32], strides = [1, 1]} : vector<8x96xf32> to vector<8x32xf32>
    %212 = vector.extract_strided_slice %210 {offsets = [0, 32], sizes = [8, 32], strides = [1, 1]} : vector<8x96xf32> to vector<8x32xf32>
    %213 = vector.extract_strided_slice %210 {offsets = [0, 64], sizes = [8, 32], strides = [1, 1]} : vector<8x96xf32> to vector<8x32xf32>
    %214 = vector.extract_strided_slice %204 {offsets = [0, 96], sizes = [8, 32], strides = [1, 1]} : vector<8x128xf32> to vector<8x32xf32>
    %215 = math.tanh %214 : vector<8x32xf32>
    %216 = arith.mulf %212, %194 : vector<8x32xf32>
    %217 = arith.mulf %211, %215 : vector<8x32xf32>
    %218 = arith.addf %216, %217 : vector<8x32xf32>
    %219 = math.tanh %218 : vector<8x32xf32>
    %220 = arith.mulf %213, %219 : vector<8x32xf32>
    %221 = vector.shape_cast %220 : vector<8x32xf32> to vector<1x8x32xf32>
    %222 = arith.index_cast %c5_i32 : i32 to index
    %c0_95 = arith.constant 0 : index
    %c0_96 = arith.constant 0 : index
    %223 = vector.load %arg12[%222, %c0_95, %c0_96] : memref<8x8x32xf32, #tpu.memory_space<vmem>>, vector<1x8x32xf32>
    tpu.vector_store %arg12[%222, %c0_95, %c0_96], %221 {strides = array<i32>} : memref<8x8x32xf32, #tpu.memory_space<vmem>>, vector<1x8x32xf32>,
    %c6_i32 = arith.constant 6 : i32
    %224 = arith.index_cast %c6_i32 : i32 to index
    %c0_97 = arith.constant 0 : index
    %c0_98 = arith.constant 0 : index
    %225 = vector.load %arg11[%224, %c0_97, %c0_98] : memref<8x8x128xf32, #tpu.memory_space<vmem>>, vector<1x8x128xf32>
    %226 = vector.shape_cast %225 : vector<1x8x128xf32> to vector<8x128xf32>
    %cst_99 = arith.constant dense<0.000000e+00> : vector<8x128xf32>
    %227 = tpu.matmul %220, %77, %cst_99 {dimension_numbers = #tpu.dot_dimension_numbers<[1], [0], [0], [1], [0, 0, 1, 1], [], []>} : vector<8x32xf32>, vector<32x128xf32>, vector<8x128xf32> -> vector<8x128xf32>
    %228 = arith.addf %226, %227 : vector<8x128xf32>
    %229 = vector.extract_strided_slice %228 {offsets = [0, 0], sizes = [8, 96], strides = [1, 1]} : vector<8x128xf32> to vector<8x96xf32>
    %230 = arith.negf %229 : vector<8x96xf32>
    %231 = math.exp %230 : vector<8x96xf32>
    %cst_100 = arith.constant 1.000000e+00 : f32
    %232 = vector.broadcast %cst_100 : f32 to vector<8x96xf32>
    %233 = arith.addf %232, %231 : vector<8x96xf32>
    %234 = arith.divf %232, %233 : vector<8x96xf32>
    %235 = vector.extract_strided_slice %234 {offsets = [0, 0], sizes = [8, 32], strides = [1, 1]} : vector<8x96xf32> to vector<8x32xf32>
    %236 = vector.extract_strided_slice %234 {offsets = [0, 32], sizes = [8, 32], strides = [1, 1]} : vector<8x96xf32> to vector<8x32xf32>
    %237 = vector.extract_strided_slice %234 {offsets = [0, 64], sizes = [8, 32], strides = [1, 1]} : vector<8x96xf32> to vector<8x32xf32>
    %238 = vector.extract_strided_slice %228 {offsets = [0, 96], sizes = [8, 32], strides = [1, 1]} : vector<8x128xf32> to vector<8x32xf32>
    %239 = math.tanh %238 : vector<8x32xf32>
    %240 = arith.mulf %236, %218 : vector<8x32xf32>
    %241 = arith.mulf %235, %239 : vector<8x32xf32>
    %242 = arith.addf %240, %241 : vector<8x32xf32>
    %243 = math.tanh %242 : vector<8x32xf32>
    %244 = arith.mulf %237, %243 : vector<8x32xf32>
    %245 = vector.shape_cast %244 : vector<8x32xf32> to vector<1x8x32xf32>
    %246 = arith.index_cast %c6_i32 : i32 to index
    %c0_101 = arith.constant 0 : index
    %c0_102 = arith.constant 0 : index
    %247 = vector.load %arg12[%246, %c0_101, %c0_102] : memref<8x8x32xf32, #tpu.memory_space<vmem>>, vector<1x8x32xf32>
    tpu.vector_store %arg12[%246, %c0_101, %c0_102], %245 {strides = array<i32>} : memref<8x8x32xf32, #tpu.memory_space<vmem>>, vector<1x8x32xf32>,
    %c7_i32 = arith.constant 7 : i32
    %248 = arith.index_cast %c7_i32 : i32 to index
    %c0_103 = arith.constant 0 : index
    %c0_104 = arith.constant 0 : index
    %249 = vector.load %arg11[%248, %c0_103, %c0_104] : memref<8x8x128xf32, #tpu.memory_space<vmem>>, vector<1x8x128xf32>
    %250 = vector.shape_cast %249 : vector<1x8x128xf32> to vector<8x128xf32>
    %cst_105 = arith.constant dense<0.000000e+00> : vector<8x128xf32>
    %251 = tpu.matmul %244, %77, %cst_105 {dimension_numbers = #tpu.dot_dimension_numbers<[1], [0], [0], [1], [0, 0, 1, 1], [], []>} : vector<8x32xf32>, vector<32x128xf32>, vector<8x128xf32> -> vector<8x128xf32>
    %252 = arith.addf %250, %251 : vector<8x128xf32>
    %253 = vector.extract_strided_slice %252 {offsets = [0, 0], sizes = [8, 96], strides = [1, 1]} : vector<8x128xf32> to vector<8x96xf32>
    %254 = arith.negf %253 : vector<8x96xf32>
    %255 = math.exp %254 : vector<8x96xf32>
    %cst_106 = arith.constant 1.000000e+00 : f32
    %256 = vector.broadcast %cst_106 : f32 to vector<8x96xf32>
    %257 = arith.addf %256, %255 : vector<8x96xf32>
    %258 = arith.divf %256, %257 : vector<8x96xf32>
    %259 = vector.extract_strided_slice %258 {offsets = [0, 0], sizes = [8, 32], strides = [1, 1]} : vector<8x96xf32> to vector<8x32xf32>
    %260 = vector.extract_strided_slice %258 {offsets = [0, 32], sizes = [8, 32], strides = [1, 1]} : vector<8x96xf32> to vector<8x32xf32>
    %261 = vector.extract_strided_slice %258 {offsets = [0, 64], sizes = [8, 32], strides = [1, 1]} : vector<8x96xf32> to vector<8x32xf32>
    %262 = vector.extract_strided_slice %252 {offsets = [0, 96], sizes = [8, 32], strides = [1, 1]} : vector<8x128xf32> to vector<8x32xf32>
    %263 = math.tanh %262 : vector<8x32xf32>
    %264 = arith.mulf %260, %242 : vector<8x32xf32>
    %265 = arith.mulf %259, %263 : vector<8x32xf32>
    %266 = arith.addf %264, %265 : vector<8x32xf32>
    %267 = math.tanh %266 : vector<8x32xf32>
    %268 = arith.mulf %261, %267 : vector<8x32xf32>
    %269 = vector.shape_cast %268 : vector<8x32xf32> to vector<1x8x32xf32>
    %270 = arith.index_cast %c7_i32 : i32 to index
    %c0_107 = arith.constant 0 : index
    %c0_108 = arith.constant 0 : index
    %271 = vector.load %arg12[%270, %c0_107, %c0_108] : memref<8x8x32xf32, #tpu.memory_space<vmem>>, vector<1x8x32xf32>
    tpu.vector_store %arg12[%270, %c0_107, %c0_108], %269 {strides = array<i32>} : memref<8x8x32xf32, #tpu.memory_space<vmem>>, vector<1x8x32xf32>,
    %c8_i32 = arith.constant 8 : i32
    %272 = tpu.iota {dimensions = array<i32: 1>} : vector<8x32xi32>
    %c16_i32_109 = arith.constant 16 : i32
    %273 = vector.broadcast %c16_i32_109 : i32 to vector<8x32xi32>
    %274 = arith.cmpi slt, %272, %273 : vector<8x32xi32>
    %c0_110 = arith.constant 0 : index
    %c0_111 = arith.constant 0 : index
    %c0_112 = arith.constant 0 : index
    %275 = vector.load %arg12[%c0_110, %c0_111, %c0_112] : memref<8x8x32xf32, #tpu.memory_space<vmem>>, vector<1x8x32xf32>
    %276 = vector.shape_cast %275 : vector<1x8x32xf32> to vector<8x32xf32>
    %c7_113 = arith.constant 7 : index
    %c0_114 = arith.constant 0 : index
    %c0_115 = arith.constant 0 : index
    %277 = vector.load %arg12[%c7_113, %c0_114, %c0_115] : memref<8x8x32xf32, #tpu.memory_space<vmem>>, vector<1x8x32xf32>
    %278 = vector.shape_cast %277 : vector<1x8x32xf32> to vector<8x32xf32>
    %279 = arith.select %274, %276, %278 : vector<8x32xi1>, vector<8x32xf32>
    %c0_116 = arith.constant 0 : index
    %c0_117 = arith.constant 0 : index
    %c0_118 = arith.constant 0 : index
    %280 = vector.load %arg12[%c0_116, %c0_117, %c0_118] : memref<8x8x32xf32, #tpu.memory_space<vmem>>, vector<1x8x32xf32>
    %281 = vector.shape_cast %280 : vector<1x8x32xf32> to vector<8x32xf32>
    %282 = vector.shape_cast %279 : vector<8x32xf32> to vector<1x8x32xf32>
    tpu.vector_store %arg12[%c0_116, %c0_117, %c0_118], %282 {strides = array<i32>} : memref<8x8x32xf32, #tpu.memory_space<vmem>>, vector<1x8x32xf32>,
    %283 = arith.select %274, %278, %276 : vector<8x32xi1>, vector<8x32xf32>
    %c7_119 = arith.constant 7 : index
    %c0_120 = arith.constant 0 : index
    %c0_121 = arith.constant 0 : index
    %284 = vector.load %arg12[%c7_119, %c0_120, %c0_121] : memref<8x8x32xf32, #tpu.memory_space<vmem>>, vector<1x8x32xf32>
    %285 = vector.shape_cast %284 : vector<1x8x32xf32> to vector<8x32xf32>
    %286 = vector.shape_cast %283 : vector<8x32xf32> to vector<1x8x32xf32>
    tpu.vector_store %arg12[%c7_119, %c0_120, %c0_121], %286 {strides = array<i32>} : memref<8x8x32xf32, #tpu.memory_space<vmem>>, vector<1x8x32xf32>,
    %c1_122 = arith.constant 1 : index
    %c0_123 = arith.constant 0 : index
    %c0_124 = arith.constant 0 : index
    %287 = vector.load %arg12[%c1_122, %c0_123, %c0_124] : memref<8x8x32xf32, #tpu.memory_space<vmem>>, vector<1x8x32xf32>
    %288 = vector.shape_cast %287 : vector<1x8x32xf32> to vector<8x32xf32>
    %c6_125 = arith.constant 6 : index
    %c0_126 = arith.constant 0 : index
    %c0_127 = arith.constant 0 : index
    %289 = vector.load %arg12[%c6_125, %c0_126, %c0_127] : memref<8x8x32xf32, #tpu.memory_space<vmem>>, vector<1x8x32xf32>
    %290 = vector.shape_cast %289 : vector<1x8x32xf32> to vector<8x32xf32>
    %291 = arith.select %274, %288, %290 : vector<8x32xi1>, vector<8x32xf32>
    %c1_128 = arith.constant 1 : index
    %c0_129 = arith.constant 0 : index
    %c0_130 = arith.constant 0 : index
    %292 = vector.load %arg12[%c1_128, %c0_129, %c0_130] : memref<8x8x32xf32, #tpu.memory_space<vmem>>, vector<1x8x32xf32>
    %293 = vector.shape_cast %292 : vector<1x8x32xf32> to vector<8x32xf32>
    %294 = vector.shape_cast %291 : vector<8x32xf32> to vector<1x8x32xf32>
    tpu.vector_store %arg12[%c1_128, %c0_129, %c0_130], %294 {strides = array<i32>} : memref<8x8x32xf32, #tpu.memory_space<vmem>>, vector<1x8x32xf32>,
    %295 = arith.select %274, %290, %288 : vector<8x32xi1>, vector<8x32xf32>
    %c6_131 = arith.constant 6 : index
    %c0_132 = arith.constant 0 : index
    %c0_133 = arith.constant 0 : index
    %296 = vector.load %arg12[%c6_131, %c0_132, %c0_133] : memref<8x8x32xf32, #tpu.memory_space<vmem>>, vector<1x8x32xf32>
    %297 = vector.shape_cast %296 : vector<1x8x32xf32> to vector<8x32xf32>
    %298 = vector.shape_cast %295 : vector<8x32xf32> to vector<1x8x32xf32>
    tpu.vector_store %arg12[%c6_131, %c0_132, %c0_133], %298 {strides = array<i32>} : memref<8x8x32xf32, #tpu.memory_space<vmem>>, vector<1x8x32xf32>,
    %c2_134 = arith.constant 2 : index
    %c0_135 = arith.constant 0 : index
    %c0_136 = arith.constant 0 : index
    %299 = vector.load %arg12[%c2_134, %c0_135, %c0_136] : memref<8x8x32xf32, #tpu.memory_space<vmem>>, vector<1x8x32xf32>
    %300 = vector.shape_cast %299 : vector<1x8x32xf32> to vector<8x32xf32>
    %c5_137 = arith.constant 5 : index
    %c0_138 = arith.constant 0 : index
    %c0_139 = arith.constant 0 : index
    %301 = vector.load %arg12[%c5_137, %c0_138, %c0_139] : memref<8x8x32xf32, #tpu.memory_space<vmem>>, vector<1x8x32xf32>
    %302 = vector.shape_cast %301 : vector<1x8x32xf32> to vector<8x32xf32>
    %303 = arith.select %274, %300, %302 : vector<8x32xi1>, vector<8x32xf32>
    %c2_140 = arith.constant 2 : index
    %c0_141 = arith.constant 0 : index
    %c0_142 = arith.constant 0 : index
    %304 = vector.load %arg12[%c2_140, %c0_141, %c0_142] : memref<8x8x32xf32, #tpu.memory_space<vmem>>, vector<1x8x32xf32>
    %305 = vector.shape_cast %304 : vector<1x8x32xf32> to vector<8x32xf32>
    %306 = vector.shape_cast %303 : vector<8x32xf32> to vector<1x8x32xf32>
    tpu.vector_store %arg12[%c2_140, %c0_141, %c0_142], %306 {strides = array<i32>} : memref<8x8x32xf32, #tpu.memory_space<vmem>>, vector<1x8x32xf32>,
    %307 = arith.select %274, %302, %300 : vector<8x32xi1>, vector<8x32xf32>
    %c5_143 = arith.constant 5 : index
    %c0_144 = arith.constant 0 : index
    %c0_145 = arith.constant 0 : index
    %308 = vector.load %arg12[%c5_143, %c0_144, %c0_145] : memref<8x8x32xf32, #tpu.memory_space<vmem>>, vector<1x8x32xf32>
    %309 = vector.shape_cast %308 : vector<1x8x32xf32> to vector<8x32xf32>
    %310 = vector.shape_cast %307 : vector<8x32xf32> to vector<1x8x32xf32>
    tpu.vector_store %arg12[%c5_143, %c0_144, %c0_145], %310 {strides = array<i32>} : memref<8x8x32xf32, #tpu.memory_space<vmem>>, vector<1x8x32xf32>,
    %c3_146 = arith.constant 3 : index
    %c0_147 = arith.constant 0 : index
    %c0_148 = arith.constant 0 : index
    %311 = vector.load %arg12[%c3_146, %c0_147, %c0_148] : memref<8x8x32xf32, #tpu.memory_space<vmem>>, vector<1x8x32xf32>
    %312 = vector.shape_cast %311 : vector<1x8x32xf32> to vector<8x32xf32>
    %c4_149 = arith.constant 4 : index
    %c0_150 = arith.constant 0 : index
    %c0_151 = arith.constant 0 : index
    %313 = vector.load %arg12[%c4_149, %c0_150, %c0_151] : memref<8x8x32xf32, #tpu.memory_space<vmem>>, vector<1x8x32xf32>
    %314 = vector.shape_cast %313 : vector<1x8x32xf32> to vector<8x32xf32>
    %315 = arith.select %274, %312, %314 : vector<8x32xi1>, vector<8x32xf32>
    %c3_152 = arith.constant 3 : index
    %c0_153 = arith.constant 0 : index
    %c0_154 = arith.constant 0 : index
    %316 = vector.load %arg12[%c3_152, %c0_153, %c0_154] : memref<8x8x32xf32, #tpu.memory_space<vmem>>, vector<1x8x32xf32>
    %317 = vector.shape_cast %316 : vector<1x8x32xf32> to vector<8x32xf32>
    %318 = vector.shape_cast %315 : vector<8x32xf32> to vector<1x8x32xf32>
    tpu.vector_store %arg12[%c3_152, %c0_153, %c0_154], %318 {strides = array<i32>} : memref<8x8x32xf32, #tpu.memory_space<vmem>>, vector<1x8x32xf32>,
    %319 = arith.select %274, %314, %312 : vector<8x32xi1>, vector<8x32xf32>
    %c4_155 = arith.constant 4 : index
    %c0_156 = arith.constant 0 : index
    %c0_157 = arith.constant 0 : index
    %320 = vector.load %arg12[%c4_155, %c0_156, %c0_157] : memref<8x8x32xf32, #tpu.memory_space<vmem>>, vector<1x8x32xf32>
    %321 = vector.shape_cast %320 : vector<1x8x32xf32> to vector<8x32xf32>
    %322 = vector.shape_cast %319 : vector<8x32xf32> to vector<1x8x32xf32>
    tpu.vector_store %arg12[%c4_155, %c0_156, %c0_157], %322 {strides = array<i32>} : memref<8x8x32xf32, #tpu.memory_space<vmem>>, vector<1x8x32xf32>,
    %c0_158 = arith.constant 0 : index
    %c0_159 = arith.constant 0 : index
    %c0_160 = arith.constant 0 : index
    %323 = vector.load %arg12[%c0_158, %c0_159, %c0_160] : memref<8x8x32xf32, #tpu.memory_space<vmem>>, vector<8x8x32xf32>
    %c0_161 = arith.constant 0 : index
    %c0_162 = arith.constant 0 : index
    %324 = vector.load %arg7[%c0_161, %c0_162] : memref<8x32xf32, #tpu.memory_space<vmem>>, vector<8x32xf32>
    %325 = math.tanh %323 : vector<8x8x32xf32>
    %326 = vector.shape_cast %324 : vector<8x32xf32> to vector<1x8x32xf32>
    %327 = vector.broadcast %326 : vector<1x8x32xf32> to vector<8x8x32xf32>
    %328 = arith.mulf %325, %327 : vector<8x8x32xf32>
    %cst_163 = arith.constant dense<0.000000e+00> : vector<8x8xf32>
    %329 = vector.multi_reduction <add>, %328, %cst_163 [2] : vector<8x8x32xf32> to vector<8x8xf32>
    %330 = vector.shape_cast %329 : vector<8x8xf32> to vector<8x8x1xf32>
    %cst_164 = arith.constant dense<0xFF800000> : vector<8x1xf32>
    %331 = vector.multi_reduction <maximumf>, %330, %cst_164 [0] : vector<8x8x1xf32> to vector<8x1xf32>
    %332 = vector.shape_cast %331 : vector<8x1xf32> to vector<1x8x1xf32>
    %333 = vector.broadcast %332 : vector<1x8x1xf32> to vector<8x8x1xf32>
    %334 = arith.subf %330, %333 : vector<8x8x1xf32>
    %335 = math.exp %334 : vector<8x8x1xf32>
    %cst_165 = arith.constant dense<0.000000e+00> : vector<8x1xf32>
    %336 = vector.multi_reduction <add>, %335, %cst_165 [0] : vector<8x8x1xf32> to vector<8x1xf32>
    %337 = vector.shape_cast %336 : vector<8x1xf32> to vector<1x8x1xf32>
    %338 = vector.broadcast %337 : vector<1x8x1xf32> to vector<8x8x1xf32>
    %339 = arith.divf %335, %338 : vector<8x8x1xf32>
    %340 = vector.broadcast %339 : vector<8x8x1xf32> to vector<8x8x32xf32>
    %341 = arith.mulf %323, %340 : vector<8x8x32xf32>
    %cst_166 = arith.constant dense<0.000000e+00> : vector<8x32xf32>
    %342 = vector.multi_reduction <add>, %341, %cst_166 [0] : vector<8x8x32xf32> to vector<8x32xf32>
    %343 = math.tanh %342 : vector<8x32xf32>
    %c0_167 = arith.constant 0 : index
    %c0_168 = arith.constant 0 : index
    %344 = vector.load %arg8[%c0_167, %c0_168] : memref<32x128xf32, #tpu.memory_space<vmem>>, vector<32x128xf32>
    %cst_169 = arith.constant dense<0.000000e+00> : vector<8x128xf32>
    %345 = tpu.matmul %343, %344, %cst_169 {dimension_numbers = #tpu.dot_dimension_numbers<[1], [0], [0], [1], [0, 0, 1, 1], [], []>} : vector<8x32xf32>, vector<32x128xf32>, vector<8x128xf32> -> vector<8x128xf32>
    %c0_170 = arith.constant 0 : index
    %c0_171 = arith.constant 0 : index
    %346 = vector.load %arg9[%c0_170, %c0_171] : memref<8x128xf32, #tpu.memory_space<vmem>>, vector<8x128xf32>
    %347 = arith.addf %345, %346 : vector<8x128xf32>
    %348 = tpu.iota {dimensions = array<i32: 1>} : vector<8x128xi32>
    %c12_i32 = arith.constant 12 : i32
    %349 = vector.broadcast %c12_i32 : i32 to vector<8x128xi32>
    %350 = arith.cmpi slt, %348, %349 : vector<8x128xi32>
    %cst_172 = arith.constant -1.000000e+30 : f32
    %351 = vector.broadcast %cst_172 : f32 to vector<8x128xf32>
    %352 = arith.select %350, %347, %351 : vector<8x128xi1>, vector<8x128xf32>
    %cst_173 = arith.constant dense<0xFF800000> : vector<8xf32>
    %353 = vector.multi_reduction <maximumf>, %352, %cst_173 [1] : vector<8x128xf32> to vector<8xf32>
    %354 = vector.shape_cast %353 : vector<8xf32> to vector<8x1xf32>
    %355 = vector.broadcast %354 : vector<8x1xf32> to vector<8x128xf32>
    %356 = arith.subf %352, %355 : vector<8x128xf32>
    %357 = math.exp %356 : vector<8x128xf32>
    %cst_174 = arith.constant dense<0.000000e+00> : vector<8xf32>
    %358 = vector.multi_reduction <add>, %357, %cst_174 [1] : vector<8x128xf32> to vector<8xf32>
    %359 = vector.shape_cast %358 : vector<8xf32> to vector<8x1xf32>
    %360 = vector.broadcast %359 : vector<8x1xf32> to vector<8x128xf32>
    %361 = arith.divf %357, %360 : vector<8x128xf32>
    %c0_175 = arith.constant 0 : index
    %c0_176 = arith.constant 0 : index
    %362 = vector.load %arg10[%c0_175, %c0_176] : memref<8x128xf32, #tpu.memory_space<vmem>>, vector<8x128xf32>
    tpu.vector_store %arg10[%c0_175, %c0_176], %361 {strides = array<i32>} : memref<8x128xf32, #tpu.memory_space<vmem>>, vector<8x128xf32>,
    return
  }
  func.func @transform_0(%arg0: i32) -> (i32, i32, i32) {
    %c0_i32 = arith.constant 0 : i32
    %c0_i32_0 = arith.constant 0 : i32
    %c0_i32_1 = arith.constant 0 : i32
    return %c0_i32, %arg0, %c0_i32_0 : i32, i32, i32
  }
  func.func @transform_1(%arg0: i32) -> (i32, i32) {
    %c0_i32 = arith.constant 0 : i32
    %c0_i32_0 = arith.constant 0 : i32
    %c0_i32_1 = arith.constant 0 : i32
    return %c0_i32, %c0_i32_0 : i32, i32
  }
  func.func @transform_2(%arg0: i32) -> (i32, i32) {
    %c0_i32 = arith.constant 0 : i32
    %c0_i32_0 = arith.constant 0 : i32
    %c0_i32_1 = arith.constant 0 : i32
    return %c0_i32, %c0_i32_0 : i32, i32
  }
  func.func @transform_3(%arg0: i32) -> (i32, i32) {
    %c0_i32 = arith.constant 0 : i32
    %c0_i32_0 = arith.constant 0 : i32
    %c0_i32_1 = arith.constant 0 : i32
    return %c0_i32, %c0_i32_0 : i32, i32
  }
  func.func @transform_4(%arg0: i32) -> (i32, i32) {
    %c0_i32 = arith.constant 0 : i32
    %c0_i32_0 = arith.constant 0 : i32
    return %arg0, %c0_i32 : i32, i32
  }
  func.func @transform_5(%arg0: i32) -> (i32, i32) {
    %c0_i32 = arith.constant 0 : i32
    %c0_i32_0 = arith.constant 0 : i32
    return %arg0, %c0_i32 : i32, i32
  }
  func.func @transform_6(%arg0: i32) -> (i32, i32) {
    %c0_i32 = arith.constant 0 : i32
    %c0_i32_0 = arith.constant 0 : i32
    return %arg0, %c0_i32 : i32, i32
  }
  func.func @transform_7(%arg0: i32) -> (i32, i32) {
    %c0_i32 = arith.constant 0 : i32
    %c0_i32_0 = arith.constant 0 : i32
    %c0_i32_1 = arith.constant 0 : i32
    return %c0_i32, %c0_i32_0 : i32, i32
  }
  func.func @transform_8(%arg0: i32) -> (i32, i32) {
    %c0_i32 = arith.constant 0 : i32
    %c0_i32_0 = arith.constant 0 : i32
    return %arg0, %c0_i32 : i32, i32
  }
  func.func @transform_9(%arg0: i32) -> (i32, i32) {
    %c0_i32 = arith.constant 0 : i32
    %c0_i32_0 = arith.constant 0 : i32
    return %arg0, %c0_i32 : i32, i32
  }
}

</mosaic_0001>

<bundles_post_ra>
// kernel: tpu_custom_call.1
= control target key start
LH: loop header
LB: loop body
LE: loop exit
PB: predicated region body
PF: predicated region fallthrough
CT: control target
= control target key end

     0   :  { %14 = vsyncpa [#allocation5], 0  ;;  %s2291_s0 = inlined_call_operand.hbm [shape: f32[8,8,24], index: 0, kind: input, shape index: {}]   ;;  %s2292_s1 = inlined_call_operand.hbm [shape: bf16[24,128], index: 1, kind: input, shape index: {}]   ;;  %s2293_s2 = inlined_call_operand.vmem [shape: f32[1,128], index: 2, kind: input, shape index: {}]   ;;  %s2294_s3 = inlined_call_operand.hbm [shape: f32[32,128], index: 3, kind: input, shape index: {}]   ;;  %s2295_s4 = inlined_call_operand.vmem [shape: f32[8,32], index: 4, kind: input, shape index: {}]   ;;  %s2296_s5 = inlined_call_operand.vmem [shape: f32[8,32], index: 5, kind: input, shape index: {}]   ;;  %s2297_s6 = inlined_call_operand.hbm [shape: f32[8,32], index: 6, kind: input, shape index: {}]   ;;  %s2298_s7 = inlined_call_operand.hbm [shape: f32[32,128], index: 7, kind: input, shape index: {}]   ;;  %s2299_s8 = inlined_call_operand.vmem [shape: f32[8,128], index: 8, kind: input, shape index: {}]   ;;  %s2300_s9 = inlined_call_operand.hbm [shape: f32[8,128], index: 9, kind: output, shape index: {}]  }
   0x1   :  { %15 = vsyncpa [#allocation8], 0 }
   0x2   :  { %16 = vsyncpa [#allocation11], 0 }
   0x3   :  { %17 = vsyncpa [#allocation6], 0  ;;  %s1863_s30 = smov [#allocation7]   ;;  %s1723_s13 = scalar_lea.hbm %s2292_s1, 192 }
   0x4   :  { %s35_s10 = sshll.u32 %s1863_s30, 4  ;;  %p1724_p0 = scmp.ne.s32.totalorder %s2292_s1, %s1723_s13  ;;  %s36_s10 = int_to_ptr.vmem [resolvable:$true] %s35_s10 }
   0x5   :  { %p1727_p1 = scmp.lt.u32.totalorder %s1723_s13, %s2292_s1 }
   0x7   :  { %p1729_p2 = pnand %p1727_p1, %p1724_p0 }
   0x9   :  { %1732 = shalt.err (!%p1729_p2)
}
   0xa   :  { %s1733_s18 = scalar_lea.vmem %s36_s10, 192  ;;  %p1738_p4 = scmp.lt.s32.totalorder %s36_s10, %s36_s10 }
   0xb   :  { %p1734_p3 = scmp.ne.s32.totalorder %s36_s10, %s1733_s18  ;;  %p1739_p5 = scmp.lt.s32.totalorder %s1733_s18, %s1733_s18 }
   0xd   :  { %p1740_p6 = por %p1739_p5, %p1738_p4 }
   0xf   :  { %p1741_p7 = pnand %p1740_p6, %p1734_p3 }
  0x11   :  { %1744 = shalt.err (!%p1741_p7)
}
  0x12   :  { %s1864_s19 = smov 64   ;;  %s1865_s20 = smov 4  }
  0x13   :  { %41 = dma.hbm_to_vmem [thread:$0]  %s2292_s1, 192, %s36_s10, [#allocation8], %s1864_s19, %s1864_s19, %s1865_s20  }
  0x14   :  { %s1866_s23 = smov [#allocation10]   ;;  %s1867_s25 = smov [#allocation4]  }
  0x15   :  { %s66_s24 = sshll.u32 %s1866_s23, 4  ;;  %s23_s26 = sshll.u32 %s1867_s25, 4  ;;  %s67_s24 = int_to_ptr.vmem [resolvable:$true] %s66_s24  ;;  %s24_s26 = int_to_ptr.vmem [resolvable:$true] %s23_s26 }
  0x16   :  { %s1745_s29 = scalar_lea.hbm %s2297_s6, 128 }
  0x17   :  { %p1746_p8 = scmp.ne.s32.totalorder %s2297_s6, %s1745_s29  ;;  %p1749_p9 = scmp.lt.u32.totalorder %s1745_s29, %s2297_s6 }
  0x19   :  { %p1751_p10 = pnand %p1749_p9, %p1746_p8 }
  0x1b   :  { %1754 = shalt.err (!%p1751_p10)
}
  0x1c   :  { %s1755_s1 = scalar_lea.vmem %s67_s24, 128  ;;  %p1760_p12 = scmp.lt.s32.totalorder %s67_s24, %s67_s24 }
  0x1d   :  { %p1756_p11 = scmp.ne.s32.totalorder %s67_s24, %s1755_s1  ;;  %p1761_p13 = scmp.lt.s32.totalorder %s1755_s1, %s1755_s1 }
  0x1f   :  { %p1762_p0 = por %p1761_p13, %p1760_p12 }
  0x21   :  { %p1763_p1 = pnand %p1762_p0, %p1756_p11 }
  0x23   :  { %1766 = shalt.err (!%p1763_p1)
}
  0x24   :  { %69 = dma.hbm_to_vmem [thread:$0]  %s2297_s6, 128, %s67_s24, [#allocation11]  }
  0x25   :  { %s1767_s17 = scalar_lea.hbm %s2291_s0, 1024 }
  0x26   :  { %p1768_p2 = scmp.ne.s32.totalorder %s2291_s0, %s1767_s17  ;;  %p1771_p3 = scmp.lt.u32.totalorder %s1767_s17, %s2291_s0 }
  0x28   :  { %p1773_p4 = pnand %p1771_p3, %p1768_p2 }
  0x2a   :  { %1776 = shalt.err (!%p1773_p4)
}
  0x2b   :  { %s1777_s23 = scalar_lea.vmem %s24_s26, 1024  ;;  %p1782_p6 = scmp.lt.s32.totalorder %s24_s26, %s24_s26 }
  0x2c   :  { %p1778_p5 = scmp.ne.s32.totalorder %s24_s26, %s1777_s23  ;;  %p1783_p7 = scmp.lt.s32.totalorder %s1777_s23, %s1777_s23 }
  0x2e   :  { %p1784_p8 = por %p1783_p7, %p1782_p6 }
  0x30   :  { %p1785_p9 = pnand %p1784_p8, %p1778_p5 }
  0x32   :  { %1788 = shalt.err (!%p1785_p9)
}
  0x33   :  { %s1868_s6 = smov 128   ;;  %s1869_s24 = smov 8  }
  0x34   :  { %29 = dma.hbm_to_vmem [thread:$0]  %s2291_s0, 1024, %s24_s26, [#allocation5], %s1868_s6, %s1868_s6, %s1869_s24  }
  0x35   :  { %s1870_s28 = smov [#allocation9]   ;;  %s1871_s30 = smov [#allocation12]  }
  0x36   :  { %s49_s29 = sshll.u32 %s1870_s28, 4  ;;  %s75_s11 = sshll.u32 %s1871_s30, 4  ;;  %s50_s29 = int_to_ptr.vmem [resolvable:$true] %s49_s29  ;;  %s76_s11 = int_to_ptr.vmem [resolvable:$true] %s75_s11 }
  0x37   :  { %s1789_s1 = scalar_lea.hbm %s2294_s3, 512 }
  0x38   :  { %p1790_p10 = scmp.ne.s32.totalorder %s2294_s3, %s1789_s1  ;;  %p1793_p11 = scmp.lt.u32.totalorder %s1789_s1, %s2294_s3 }
  0x3a   :  { %p1795_p12 = pnand %p1793_p11, %p1790_p10 }
  0x3c   :  { %1798 = shalt.err (!%p1795_p12)
}
  0x3d   :  { %s1799_s0 = scalar_lea.vmem %s50_s29, 512  ;;  %p1804_p0 = scmp.lt.s32.totalorder %s50_s29, %s50_s29 }
  0x3e   :  { %p1800_p13 = scmp.ne.s32.totalorder %s50_s29, %s1799_s0  ;;  %p1805_p1 = scmp.lt.s32.totalorder %s1799_s0, %s1799_s0 }
  0x40   :  { %p1806_p2 = por %p1805_p1, %p1804_p0 }
  0x42   :  { %p1807_p3 = pnand %p1806_p2, %p1800_p13 }
  0x44   :  { %1810 = shalt.err (!%p1807_p3)
}
  0x45   :  { %55 = dma.hbm_to_vmem [thread:$0]  %s2294_s3, 512, %s50_s29, [#allocation8], %s1868_s6, %s1868_s6, %s1869_s24  }
  0x46   :  { %s1811_s21 = scalar_lea.hbm %s2298_s7, 512 }
  0x47   :  { %p1812_p4 = scmp.ne.s32.totalorder %s2298_s7, %s1811_s21  ;;  %p1815_p5 = scmp.lt.u32.totalorder %s1811_s21, %s2298_s7 }
  0x49   :  { %p1817_p6 = pnand %p1815_p5, %p1812_p4 }
  0x4b   :  { %1820 = shalt.err (!%p1817_p6)
}
  0x4c   :  { %s1821_s28 = scalar_lea.vmem %s76_s11, 512  ;;  %p1826_p8 = scmp.lt.s32.totalorder %s76_s11, %s76_s11 }
  0x4d   :  { %p1822_p7 = scmp.ne.s32.totalorder %s76_s11, %s1821_s28  ;;  %p1827_p9 = scmp.lt.s32.totalorder %s1821_s28, %s1821_s28 }
  0x4f   :  { %p1828_p10 = por %p1827_p9, %p1826_p8 }
  0x51   :  { %p1829_p11 = pnand %p1828_p10, %p1822_p7 }
  0x53   :  { %1832 = shalt.err (!%p1829_p11)
}
  0x54   :  { %81 = dma.hbm_to_vmem [thread:$0]  %s2298_s7, 512, %s76_s11, [#allocation11], %s1868_s6, %s1868_s6, %s1869_s24  }
  0x55   :  { %1855 = dma.done.wait [#allocation5], 1024  }
  0x56   :  { %1856 = vsyncadd [#allocation5], 4294966272 }
  0x57   :  { %1857 = dma.done.wait [#allocation8], 704  }
  0x58   :  { %1858 = vsyncadd [#allocation8], 4294966592 }
  0x59   :  { %1859 = dma.done.wait [#allocation11], 640  }
  0x5a   :  { %1860 = vsyncadd [#allocation11], 4294966656  ;;  %v1872_v0 = vmov 0.0|0.0   ;;  %vm1873_vm0 = vmmov 0   ;;  %v1874_v1 = vmov 0.0   ;;  %v1617_v2 = vld [vmem:[#allocation7] sm:$0xff]   ;;  %v221_v24 = vlaneseq }
  0x5b   :  { %1548 = vmatprep.subr.bf16.mxu1 %v1872_v0  ;;  %1457 = vmatprep.mubr.msk.f32.mxu1 %vm1873_vm0, %v1874_v1  ;;  %v1618_v3 = vld [vmem:[#allocation7 + $0x8] ss:$0 sps:$4 sm:$0xff]   ;;  %vm144_vm1 = vcmask 1043456   ;;  %v100_v4 = vld [vmem:[#allocation4] sm:$0xff]  ;;  %vm131_vm2 = vcmask 195584   ;;  %v102_v6 = vld [vmem:[#allocation4 + $0x10] sm:$0xff] }
  0x5c   :  { %1437 = vmatprep.subr.bf16.mxu0 %v1617_v2  ;;  %v101_v5 = vld [vmem:[#allocation4 + $0x8] sm:$0xff]  ;;  %v103_v8 = vld [vmem:[#allocation4 + $0x18] sm:$0xff]  ;;  %v146_v11 = vsel %vm144_vm1, %v1618_v3, 0  ;;  %v104_v13 = vld [vmem:[#allocation4 + $0x20] sm:$0xff]  ;;  %vm274_vm3 = vcmask 261120   ;;  %v2033_v27 = vand.u32 127, %v221_v24 }
  0x5d   :  { %1438 = vmatpush3.bf16.msra.mxu0 %v1617_v2  ;;  %v108_v7 = vpack.c.bf16 %v101_v5, %v100_v4  ;;  %v267_v9 = vld [vmem:[#allocation9] sm:$0xff]  ;;  %v268_v10 = vld [vmem:[#allocation9 + $0x8] sm:$0xff]  ;;  %v269_v15 = vld [vmem:[#allocation9 + $0x10] sm:$0xff]  ;;  %v109_v17 = vpack.c.bf16 %v103_v8, %v102_v6  ;;  %s1876_s12 = smov [#allocation13]  }
  0x5e   :  { %1602 = vmatprep.subr.msk.bf16.mxu0 %vm144_vm1, %v1618_v3  ;;  %v2001_v12 = vpack.c.bf16 %v268_v10, %v267_v9  ;;  %v105_v14 = vld [vmem:[#allocation4 + $0x28] sm:$0xff]  ;;  %v271_v20 = vld [vmem:[%s2295_s4] sm:$0xff]  ;;  %v106_v21 = vld [vmem:[#allocation4 + $0x30] sm:$0xff]  ;;  %v227_v35 = vand.u32 31, %v2033_v27  ;;  %vm1110_vm5 = vcmp.lt.s32.totalorder %v2033_v27, 16  ;;  %vm1333_vm6 = vcmp.lt.s32.totalorder %v2033_v27, 12 }
  0x5f   :  { %1441 = vmatprep.mubr.msk.bf16.mxu0 %vm131_vm2, %v108_v7  ;;  %v270_v16 = vld [vmem:[#allocation9 + $0x18] sm:$0xff]  ;;  %v110_v19 = vpack.c.bf16 %v105_v14, %v104_v13  ;;  %v107_v22 = vld [vmem:[#allocation4 + $0x38] sm:$0xff]  ;;  %v1362_v25 = vld [vmem:[%s2293_s2] ss:$0 sm:$0xff]  ;;  %s1875_s2 = smov 32   ;;  %s1351_s13 = sshll.u32 %s1876_s12, 4  ;;  %s1352_s13 = int_to_ptr.vmem [resolvable:$true] %s1351_s13 }
  0x60   :  { %1550 = vmatpush3.bf16.msra.mxu1 %v2001_v12  ;;  %v2005_v18 = vpack.c.bf16 %v270_v16, %v269_v15  ;;  %v111_v23 = vpack.c.bf16 %v107_v22, %v106_v21  ;;  %vm2042_vm4 = vcmp.lt.s32.totalorder %v227_v35, 16  ;;  %v272_v57 = vld [vmem:[%s2296_s5] sm:$0xff]  ;;  %p1838_p13 = scmp.lt.s32.totalorder %s1352_s13, %s1352_s13 }
  0x61   :  { %1440 = vmatpush3.bf16.msra.mxu0 %v146_v11  ;;  %1551 = vmatprep.subr.bf16.mxu1 %v1872_v0 }
  0x62   :  { %1560 = vmatprep.subr.bf16.mxu0 %v1872_v0 }
  0x64   :  { %1442 = vmatmul.mubr.msk.bf16.vlgmr.msra.gmra.mrb[0].mxu0 %vm131_vm2, %v109_v17  ;;  %1553 = vmatpush3.bf16.msra.mxu1 %v2005_v18 }
  0x65   :  { %1445 = vmatprep.mubr.msk.bf16.mxu0 %vm131_vm2, %v110_v19  ;;  %1554 = vmatprep.subr.bf16.mxu1 %v1872_v0 }
  0x66   :  { %1562 = vmatpush3.bf16.msra.mxu0 %v2001_v12 }
  0x67   :  { %1458 = vmatmul.mubr.msk.f32.vlgmr.msra.gmra.mrb[0].mxu1 %vm274_vm3, %v271_v20  ;;  %1563 = vmatprep.subr.bf16.mxu0 %v1872_v0 }
  0x68   :  { %1556 = vmatpush3.bf16.msra.mxu1 %v2001_v12  ;;  %1468 = vmatprep.mubr.msk.f32.mxu1 %vm1873_vm0, %v1874_v1 }
  0x69   :  { %1557 = vmatprep.subr.bf16.mxu1 %v1872_v0 }
  0x6a   :  { %1565 = vmatpush3.bf16.msra.mxu0 %v2005_v18 }
  0x6b   :  { %1572 = vmatprep.subr.bf16.mxu0 %v1872_v0 }
  0x6c   :  { %1446 = vmatmul.mubr.msk.bf16.gmra.mrb[4].mxu0 %vm131_vm2, %v111_v23  ;;  %1559 = vmatpush3.bf16.msra.mxu1 %v2005_v18 }
  0x6d   :  { %1479 = vmatprep.mubr.msk.f32.mxu0 %vm1873_vm0, %v1874_v1  ;;  %1566 = vmatprep.subr.bf16.mxu1 %v1872_v0 }
 0x137   :  { %v1443_v26 = vpop.f32.mrb[0].mxu0 }
 0x138   :  { %v2035_v28 = vadd.f32 %v1443_v26, %v1362_v25  ;;  %v182_v29 = vpop.f32.mrb[1].mxu0 }
 0x139   :  { %v1444_v30 = vpop.f32.mrb[2].mxu0  ;;  %v2050_v43 = vadd.f32 %v1362_v25, %v182_v29 }
 0x13a   :  { %v2037_v31 = vadd.f32 %v1444_v30, %v1362_v25  ;;  %v185_v32 = vpop.f32.mrb[3].mxu0  ;;  %v344_v33 = vpop.f32.mrb[0].mxu1 }
 0x13b   :  { %v2039_v34 = vadd.f32 %v1362_v25, %v185_v32  ;;  %v1459_v36 = vpop.f32.mrb[1].mxu1 }
 0x13f   :  { %v1447_v37 = vpop.f32.mrb[4].mxu0 }
 0x140   :  { %v2046_v39 = vadd.f32 %v1447_v37, %v1362_v25  ;;  %v198_v40 = vpop.f32.mrb[5].mxu0 }
 0x141   :  { %v2048_v41 = vadd.f32 %v1362_v25, %v198_v40  ;;  %v1448_v42 = vpop.f32.mrb[6].mxu0 }
 0x142   :  { %v2052_v44 = vadd.f32 %v1448_v42, %v1362_v25  ;;  %v201_v45 = vpop.f32.mrb[7].mxu0  ;;  %v247_v46 = vsel %vm2042_vm4, %v2039_v34, %v2046_v39  ;;  %v249_v47 = vsel %vm2042_vm4, %v2046_v39, %v2039_v34 }
 0x143   :  { %v2062_v48 = vadd.f32 %v1362_v25, %v201_v45  ;;  %v263_v49 = vsel %vm2042_vm4, %v2037_v31, %v2048_v41  ;;  %v265_v50 = vsel %vm2042_vm4, %v2048_v41, %v2037_v31 }
 0x144   :  { %v239_v51 = vsel %vm2042_vm4, %v2050_v43, %v2052_v44  ;;  %v241_v52 = vsel %vm2042_vm4, %v2052_v44, %v2050_v43 }
 0x145   :  { %v348_v53 = vadd.f32 %v344_v33, %v239_v51  ;;  %v255_v54 = vsel %vm2042_vm4, %v2035_v28, %v2062_v48  ;;  %v257_v55 = vsel %vm2042_vm4, %v2062_v48, %v2035_v28 }
 0x147   :  { %1619 = vtanh.f32 %v348_v53  ;;  %v1370_v58 = vmul.f32 -1.442695, %v348_v53 }
 0x149   :  { %1621 = vpow2.f32 %v1370_v58 }
 0x151   :  { %v1620_v56 = vpop.eup %1619 }
 0x152   :  { %362 = vrot.lane.b32.xlu0 %v1620_v56, %s1875_s2 }
 0x153   :  { %v1622_v59 = vpop.eup %1621 }
 0x154   :  { %v352_v60 = vadd.f32 1.0, %v1622_v59 }
 0x156   :  { %357 = vrot.lane.b32.xlu0 %v272_v57, %s1875_s2  ;;  %1623 = vrcp.f32 %v352_v60 }
 0x160   :  { %v1624_v61 = vpop.eup %1623 }
 0x1c4   :  { %v363_v62 = vpop.permute.xlu0 %362 }
 0x1c5   :  { %v365_v63 = vmul.f32 %v1624_v61, %v363_v62 }
 0x1c7   :  { %367 = vrot.lane.b32.xlu1 %v365_v63, %s1875_s2 }
 0x1c8   :  { %v358_v2 = vpop.permute.xlu0 %357 }
 0x1c9   :  { %v360_v3 = vmul.f32 %v1624_v61, %v358_v2 }
 0x239   :  { %v368_v4 = vpop.permute.xlu1 %367 }
 0x23a   :  { %v370_v5 = vadd.f32 %v368_v4, %v360_v3 }
 0x23c   :  { %1625 = vtanh.f32 %v370_v5 }
 0x246   :  { %v1626_v6 = vpop.eup %1625 }
 0x247   :  { %373 = vrot.lane.b32.xlu1 %v1626_v6, %s1875_s2 }
 0x2b9   :  { %v374_v7 = vpop.permute.xlu1 %373 }
 0x2ba   :  { %v376_v8 = vmul.f32 %v1624_v61, %v374_v7 }
 0x2bc   :  { %378 = vrot.lane.b32.xlu0 %v376_v8, %s1864_s19 }
 0x32e   :  { %v379_v9 = vpop.permute.xlu0 %378 }
 0x32f   :  { %381 = vst.msk [vmem:[#allocation3] sm:$0xff] %vm274_vm3, %v379_v9  ;;  %1469 = vmatmul.mubr.msk.f32.vlgmr.msra.gmra.mrb[2].mxu1 %vm274_vm3, %v379_v9 }
 0x330   :  { %1568 = vmatpush3.bf16.msra.mxu1 %v2001_v12  ;;  %1490 = vmatprep.mubr.msk.f32.mxu1 %vm1873_vm0, %v1874_v1 }
 0x331   :  { %1569 = vmatprep.subr.bf16.mxu1 %v1872_v0 }
 0x334   :  { %1571 = vmatpush3.bf16.msra.mxu1 %v2005_v18 }
 0x335   :  { %1578 = vmatprep.subr.bf16.mxu1 %v1872_v0 }
 0x402   :  { %v451_v10 = vpop.f32.mrb[2].mxu1 }
 0x403   :  { %v455_v11 = vadd.f32 %v451_v10, %v247_v46  ;;  %v1470_v13 = vpop.f32.mrb[3].mxu1 }
 0x405   :  { %1627 = vtanh.f32 %v455_v11  ;;  %v1372_v15 = vmul.f32 -1.442695, %v455_v11 }
 0x407   :  { %1629 = vpow2.f32 %v1372_v15 }
 0x40f   :  { %v1628_v14 = vpop.eup %1627 }
 0x410   :  { %465 = vrot.lane.b32.xlu1 %v1628_v14, %s1875_s2 }
 0x411   :  { %v1630_v16 = vpop.eup %1629 }
 0x412   :  { %v459_v17 = vadd.f32 1.0, %v1630_v16 }
 0x414   :  { %1631 = vrcp.f32 %v459_v17 }
 0x41e   :  { %v1632_v19 = vpop.eup %1631 }
 0x41f   :  { %v463_v22 = vmul.f32 %v1632_v19, %v370_v5 }
 0x482   :  { %v466_v20 = vpop.permute.xlu1 %465 }
 0x483   :  { %v468_v21 = vmul.f32 %v1632_v19, %v466_v20 }
 0x485   :  { %470 = vrot.lane.b32.xlu0 %v468_v21, %s1875_s2 }
 0x4f7   :  { %v471_v23 = vpop.permute.xlu0 %470 }
 0x4f8   :  { %v473_v24 = vadd.f32 %v471_v23, %v463_v22 }
 0x4fa   :  { %1633 = vtanh.f32 %v473_v24 }
 0x504   :  { %v1634_v25 = vpop.eup %1633 }
 0x505   :  { %476 = vrot.lane.b32.xlu1 %v1634_v25, %s1875_s2 }
 0x577   :  { %v477_v26 = vpop.permute.xlu1 %476 }
 0x578   :  { %v479_v29 = vmul.f32 %v1632_v19, %v477_v26 }
 0x57a   :  { %481 = vrot.lane.b32.xlu0 %v479_v29, %s1864_s19 }
 0x5ec   :  { %v482_v30 = vpop.permute.xlu0 %481 }
 0x5ed   :  { %485 = vst.msk [vmem:[#allocation3 + $0x8] sm:$0xff] %vm274_vm3, %v482_v30  ;;  %1480 = vmatmul.mubr.msk.f32.vlgmr.msra.gmra.mrb[8].mxu0 %vm274_vm3, %v482_v30 }
 0x5ee   :  { %1574 = vmatpush3.bf16.msra.mxu0 %v2001_v12  ;;  %1501 = vmatprep.mubr.msk.f32.mxu0 %vm1873_vm0, %v1874_v1 }
 0x5ef   :  { %1575 = vmatprep.subr.bf16.mxu0 %v1872_v0 }
 0x5f2   :  { %1577 = vmatpush3.bf16.msra.mxu0 %v2005_v18 }
 0x5f3   :  { %1584 = vmatprep.subr.bf16.mxu0 %v1872_v0 }
 0x6c0   :  { %v555_v32 = vpop.f32.mrb[8].mxu0 }
 0x6c1   :  { %v559_v33 = vadd.f32 %v555_v32, %v255_v54  ;;  %v1481_v35 = vpop.f32.mrb[9].mxu0 }
 0x6c3   :  { %1635 = vtanh.f32 %v559_v33  ;;  %v1374_v37 = vmul.f32 -1.442695, %v559_v33 }
 0x6c5   :  { %1637 = vpow2.f32 %v1374_v37 }
 0x6cd   :  { %v1636_v36 = vpop.eup %1635 }
 0x6ce   :  { %569 = vrot.lane.b32.xlu1 %v1636_v36, %s1875_s2 }
 0x6cf   :  { %v1638_v40 = vpop.eup %1637 }
 0x6d0   :  { %v563_v42 = vadd.f32 1.0, %v1638_v40 }
 0x6d2   :  { %1639 = vrcp.f32 %v563_v42 }
 0x6dc   :  { %v1640_v45 = vpop.eup %1639 }
 0x6dd   :  { %v567_v53 = vmul.f32 %v1640_v45, %v473_v24 }
 0x740   :  { %v570_v46 = vpop.permute.xlu1 %569 }
 0x741   :  { %v572_v51 = vmul.f32 %v1640_v45, %v570_v46 }
 0x743   :  { %574 = vrot.lane.b32.xlu0 %v572_v51, %s1875_s2 }
 0x7b5   :  { %v575_v56 = vpop.permute.xlu0 %574 }
 0x7b6   :  { %v577_v57 = vadd.f32 %v575_v56, %v567_v53 }
 0x7b8   :  { %1641 = vtanh.f32 %v577_v57 }
 0x7c2   :  { %v1642_v54 = vpop.eup %1641 }
 0x7c3   :  { %580 = vrot.lane.b32.xlu1 %v1642_v54, %s1875_s2 }
 0x835   :  { %v581_v58 = vpop.permute.xlu1 %580 }
 0x836   :  { %v583_v59 = vmul.f32 %v1640_v45, %v581_v58 }
 0x838   :  { %585 = vrot.lane.b32.xlu0 %v583_v59, %s1864_s19 }
 0x8aa   :  { %v586_v60 = vpop.permute.xlu0 %585 }
 0x8ab   :  { %589 = vst.msk [vmem:[#allocation3 + $0x10] sm:$0xff] %vm274_vm3, %v586_v60  ;;  %1491 = vmatmul.mubr.msk.f32.vlgmr.msra.gmra.mrb[4].mxu1 %vm274_vm3, %v586_v60 }
 0x8ac   :  { %1580 = vmatpush3.bf16.msra.mxu1 %v2001_v12  ;;  %1512 = vmatprep.mubr.msk.f32.mxu1 %vm1873_vm0, %v1874_v1 }
 0x8ad   :  { %1581 = vmatprep.subr.bf16.mxu1 %v1872_v0 }
 0x8b0   :  { %1583 = vmatpush3.bf16.msra.mxu1 %v2005_v18 }
 0x8b1   :  { %1590 = vmatprep.subr.bf16.mxu1 %v1872_v0 }
 0x97e   :  { %v659_v61 = vpop.f32.mrb[4].mxu1 }
 0x97f   :  { %v663_v62 = vadd.f32 %v659_v61, %v263_v49  ;;  %v1492_v63 = vpop.f32.mrb[5].mxu1 }
 0x981   :  { %1643 = vtanh.f32 %v663_v62  ;;  %v1376_v3 = vmul.f32 -1.442695, %v663_v62  ;;  %v1123_v62 = vld [vmem:[#allocation3 + $0x10] sm:$0xff] }
 0x983   :  { %1645 = vpow2.f32 %v1376_v3 }
 0x98b   :  { %v1644_v2 = vpop.eup %1643 }
 0x98c   :  { %673 = vrot.lane.b32.xlu1 %v1644_v2, %s1875_s2 }
 0x98d   :  { %v1646_v4 = vpop.eup %1645 }
 0x98e   :  { %v667_v5 = vadd.f32 1.0, %v1646_v4 }
 0x990   :  { %1647 = vrcp.f32 %v667_v5 }
 0x99a   :  { %v1648_v6 = vpop.eup %1647 }
 0x99b   :  { %v671_v9 = vmul.f32 %v1648_v6, %v577_v57 }
 0x9fe   :  { %v674_v7 = vpop.permute.xlu1 %673 }
 0x9ff   :  { %v676_v8 = vmul.f32 %v1648_v6, %v674_v7 }
 0xa01   :  { %678 = vrot.lane.b32.xlu0 %v676_v8, %s1875_s2 }
 0xa73   :  { %v679_v10 = vpop.permute.xlu0 %678 }
 0xa74   :  { %v681_v11 = vadd.f32 %v679_v10, %v671_v9 }
 0xa76   :  { %1649 = vtanh.f32 %v681_v11 }
 0xa80   :  { %v1650_v49 = vpop.eup %1649 }
 0xa81   :  { %684 = vrot.lane.b32.xlu1 %v1650_v49, %s1875_s2 }
 0xaf3   :  { %v685_v13 = vpop.permute.xlu1 %684 }
 0xaf4   :  { %v687_v14 = vmul.f32 %v1648_v6, %v685_v13 }
 0xaf6   :  { %689 = vrot.lane.b32.xlu0 %v687_v14, %s1864_s19 }
 0xb68   :  { %v690_v15 = vpop.permute.xlu0 %689 }
 0xb69   :  { %693 = vst.msk [vmem:[#allocation3 + $0x18] sm:$0xff] %vm274_vm3, %v690_v15  ;;  %1502 = vmatmul.mubr.msk.f32.vlgmr.msra.gmra.mrb[10].mxu0 %vm274_vm3, %v690_v15 }
 0xb6a   :  { %1586 = vmatpush3.bf16.msra.mxu0 %v2001_v12  ;;  %1523 = vmatprep.mubr.msk.f32.mxu0 %vm1873_vm0, %v1874_v1 }
 0xb6b   :  { %1587 = vmatprep.subr.bf16.mxu0 %v1872_v0 }
 0xb6e   :  { %1589 = vmatpush3.bf16.msra.mxu0 %v2005_v18 }
 0xb6f   :  { %1596 = vmatprep.subr.bf16.mxu0 %v1872_v0 }
 0xb70   :  { %v1129_v35 = vld [vmem:[#allocation3 + $0x18] sm:$0xff] }
 0xc3c   :  { %v763_v16 = vpop.f32.mrb[10].mxu0 }
 0xc3d   :  { %v767_v17 = vadd.f32 %v763_v16, %v265_v50  ;;  %v1503_v19 = vpop.f32.mrb[11].mxu0 }
 0xc3f   :  { %1651 = vtanh.f32 %v767_v17  ;;  %v1378_v21 = vmul.f32 -1.442695, %v767_v17  ;;  %v1117_v17 = vld [vmem:[#allocation3 + $0x8] sm:$0xff] }
 0xc41   :  { %1653 = vpow2.f32 %v1378_v21 }
 0xc49   :  { %v1652_v20 = vpop.eup %1651 }
 0xc4a   :  { %777 = vrot.lane.b32.xlu1 %v1652_v20, %s1875_s2 }
 0xc4b   :  { %v1654_v22 = vpop.eup %1653 }
 0xc4c   :  { %v771_v23 = vadd.f32 1.0, %v1654_v22 }
 0xc4e   :  { %1655 = vrcp.f32 %v771_v23 }
 0xc58   :  { %v1656_v24 = vpop.eup %1655 }
 0xc59   :  { %v775_v29 = vmul.f32 %v1656_v24, %v681_v11 }
 0xcbc   :  { %v778_v25 = vpop.permute.xlu1 %777 }
 0xcbd   :  { %v780_v26 = vmul.f32 %v1656_v24, %v778_v25 }
 0xcbf   :  { %782 = vrot.lane.b32.xlu0 %v780_v26, %s1875_s2 }
 0xd31   :  { %v783_v30 = vpop.permute.xlu0 %782 }
 0xd32   :  { %v785_v32 = vadd.f32 %v783_v30, %v775_v29 }
 0xd34   :  { %1657 = vtanh.f32 %v785_v32 }
 0xd3e   :  { %v1658_v31 = vpop.eup %1657 }
 0xd3f   :  { %788 = vrot.lane.b32.xlu1 %v1658_v31, %s1875_s2 }
 0xdb1   :  { %v789_v41 = vpop.permute.xlu1 %788 }
 0xdb2   :  { %v791_v50 = vmul.f32 %v1656_v24, %v789_v41 }
 0xdb4   :  { %793 = vrot.lane.b32.xlu0 %v791_v50, %s1864_s19 }
 0xe26   :  { %v794_v33 = vpop.permute.xlu0 %793 }
 0xe27   :  { %797 = vst.msk [vmem:[#allocation3 + $0x20] sm:$0xff] %vm274_vm3, %v794_v33  ;;  %1513 = vmatmul.mubr.msk.f32.vlgmr.msra.gmra.mrb[6].mxu1 %vm274_vm3, %v794_v33 }
 0xe28   :  { %1592 = vmatpush3.bf16.msra.mxu1 %v2001_v12  ;;  %1534 = vmatprep.mubr.msk.f32.mxu1 %vm1873_vm0, %v1874_v1 }
 0xe29   :  { %1593 = vmatprep.subr.bf16.mxu1 %v1872_v0 }
 0xe2c   :  { %1595 = vmatpush3.bf16.msra.mxu1 %v2005_v18 }
 0xe2e   :  { %v1130_v36 = vld [vmem:[#allocation3 + $0x20] sm:$0xff] }
 0xe2f   :  { %v1131_v37 = vsel %vm1110_vm5, %v1129_v35, %v1130_v36  ;;  %v1133_v40 = vsel %vm1110_vm5, %v1130_v36, %v1129_v35  ;;  %v1143_v36 = vld [vmem:[#allocation10] sm:$0xff] }
 0xe30   :  { %1132 = vst.msk [vmem:[#allocation3 + $0x18] sm:$0xff] %vm274_vm3, %v1131_v37  ;;  %1134 = vst.msk [vmem:[#allocation3 + $0x20] sm:$0xff] %vm274_vm3, %v1133_v40 }
 0xe37   :  { %v2217_v44 = vld [vmem:[#allocation3 + $0x18] sm:$0xff] }
 0xefa   :  { %v867_v12 = vpop.f32.mrb[6].mxu1 }
 0xefb   :  { %v871_v42 = vadd.f32 %v867_v12, %v257_v55  ;;  %v1514_v18 = vpop.f32.mrb[7].mxu1 }
 0xefd   :  { %1659 = vtanh.f32 %v871_v42  ;;  %v1380_v46 = vmul.f32 -1.442695, %v871_v42 }
 0xeff   :  { %1661 = vpow2.f32 %v1380_v46 }
 0xf07   :  { %v1660_v45 = vpop.eup %1659 }
 0xf08   :  { %881 = vrot.lane.b32.xlu1 %v1660_v45, %s1875_s2 }
 0xf09   :  { %v1662_v51 = vpop.eup %1661 }
 0xf0a   :  { %v875_v53 = vadd.f32 1.0, %v1662_v51 }
 0xf0c   :  { %1663 = vrcp.f32 %v875_v53 }
 0xf16   :  { %v1664_v56 = vpop.eup %1663 }
 0xf17   :  { %v879_v58 = vmul.f32 %v1664_v56, %v785_v32 }
 0xf7a   :  { %v882_v57 = vpop.permute.xlu1 %881 }
 0xf7b   :  { %v884_v54 = vmul.f32 %v1664_v56, %v882_v57 }
 0xf7d   :  { %886 = vrot.lane.b32.xlu0 %v884_v54, %s1875_s2 }
 0xfef   :  { %v887_v59 = vpop.permute.xlu0 %886 }
 0xff0   :  { %v889_v60 = vadd.f32 %v887_v59, %v879_v58 }
 0xff2   :  { %1665 = vtanh.f32 %v889_v60 }
 0xffc   :  { %v1666_v28 = vpop.eup %1665 }
 0xffd   :  { %892 = vrot.lane.b32.xlu1 %v1666_v28, %s1875_s2 }
0x106f   :  { %v893_v48 = vpop.permute.xlu1 %892 }
0x1070   :  { %v895_v55 = vmul.f32 %v1664_v56, %v893_v48  ;;  %v2232_v56 = vld [vmem:[#allocation3 + $0x20] sm:$0xff] }
0x1072   :  { %897 = vrot.lane.b32.xlu0 %v895_v55, %s1864_s19 }
0x10e4   :  { %v898_v61 = vpop.permute.xlu0 %897 }
0x10e5   :  { %901 = vst.msk [vmem:[#allocation3 + $0x28] sm:$0xff] %vm274_vm3, %v898_v61  ;;  %1524 = vmatmul.mubr.msk.f32.vlgmr.msra.gmra.mrb[12].mxu0 %vm274_vm3, %v898_v61 }
0x10e6   :  { %1545 = vmatprep.mubr.msk.f32.mxu0 %vm1873_vm0, %v1874_v1 }
0x10ec   :  { %v1124_v63 = vld [vmem:[#allocation3 + $0x28] sm:$0xff] }
0x10ed   :  { %v1125_v2 = vsel %vm1110_vm5, %v1123_v62, %v1124_v63  ;;  %v1127_v3 = vsel %vm1110_vm5, %v1124_v63, %v1123_v62 }
0x10ee   :  { %1126 = vst.msk [vmem:[#allocation3 + $0x10] sm:$0xff] %vm274_vm3, %v1125_v2  ;;  %1128 = vst.msk [vmem:[#allocation3 + $0x28] sm:$0xff] %vm274_vm3, %v1127_v3 }
0x10f5   :  { %v2229_v53 = vld [vmem:[#allocation3 + $0x10] sm:$0xff] }
0x11b8   :  { %v971_v4 = vpop.f32.mrb[12].mxu0 }
0x11b9   :  { %v975_v5 = vadd.f32 %v971_v4, %v249_v47  ;;  %v1525_v1 = vpop.f32.mrb[13].mxu0 }
0x11bb   :  { %1667 = vtanh.f32 %v975_v5  ;;  %v1382_v7 = vmul.f32 -1.442695, %v975_v5  ;;  %v1111_v5 = vld [vmem:[#allocation3] sm:$0xff] }
0x11bd   :  { %1669 = vpow2.f32 %v1382_v7 }
0x11c5   :  { %v1668_v6 = vpop.eup %1667 }
0x11c6   :  { %985 = vrot.lane.b32.xlu1 %v1668_v6, %s1875_s2 }
0x11c7   :  { %v1670_v8 = vpop.eup %1669 }
0x11c8   :  { %v979_v9 = vadd.f32 1.0, %v1670_v8 }
0x11ca   :  { %1671 = vrcp.f32 %v979_v9 }
0x11d4   :  { %v1672_v10 = vpop.eup %1671 }
0x11d5   :  { %v983_v13 = vmul.f32 %v1672_v10, %v889_v60 }
0x1238   :  { %v986_v11 = vpop.permute.xlu1 %985 }
0x1239   :  { %v988_v49 = vmul.f32 %v1672_v10, %v986_v11 }
0x123b   :  { %990 = vrot.lane.b32.xlu0 %v988_v49, %s1875_s2 }
0x12ad   :  { %v991_v14 = vpop.permute.xlu0 %990 }
0x12ae   :  { %v993_v15 = vadd.f32 %v991_v14, %v983_v13 }
0x12b0   :  { %1673 = vtanh.f32 %v993_v15 }
0x12ba   :  { %v1674_v34 = vpop.eup %1673 }
0x12bb   :  { %996 = vrot.lane.b32.xlu1 %v1674_v34, %s1875_s2  ;;  %v1255_v34 = vld [vmem:[#allocation12] sm:$0xff] }
0x132d   :  { %v997_v39 = vpop.permute.xlu1 %996 }
0x132e   :  { %v999_v47 = vmul.f32 %v1672_v10, %v997_v39  ;;  %v1256_v39 = vld [vmem:[#allocation12 + $0x8] sm:$0xff] }
0x1330   :  { %1001 = vrot.lane.b32.xlu0 %v999_v47, %s1864_s19  ;;  %v1257_v47 = vld [vmem:[#allocation12 + $0x10] sm:$0xff] }
0x13a2   :  { %v1002_v16 = vpop.permute.xlu0 %1001 }
0x13a3   :  { %1005 = vst.msk [vmem:[#allocation3 + $0x30] sm:$0xff] %vm274_vm3, %v1002_v16  ;;  %1535 = vmatmul.mubr.msk.f32.vlgmr.msra.gmra.mrb[8].mxu1 %vm274_vm3, %v1002_v16  ;;  %v1597_v16 = vpack.c.bf16 %v1256_v39, %v1255_v34 }
0x13a5   :  { %1598 = vmatpush3.bf16.msra.mxu0 %v1597_v16 }
0x13a6   :  { %1599 = vmatprep.subr.bf16.mxu0 %v1872_v0 }
0x13aa   :  { %v1118_v19 = vld [vmem:[#allocation3 + $0x30] sm:$0xff] }
0x13ab   :  { %v1119_v20 = vsel %vm1110_vm5, %v1117_v17, %v1118_v19  ;;  %v1121_v21 = vsel %vm1110_vm5, %v1118_v19, %v1117_v17  ;;  %v1258_v17 = vld [vmem:[#allocation12 + $0x18] sm:$0xff] }
0x13ac   :  { %1120 = vst.msk [vmem:[#allocation3 + $0x8] sm:$0xff] %vm274_vm3, %v1119_v20  ;;  %1122 = vst.msk [vmem:[#allocation3 + $0x30] sm:$0xff] %vm274_vm3, %v1121_v21  ;;  %v1600_v19 = vpack.c.bf16 %v1258_v17, %v1257_v47 }
0x13ae   :  { %1601 = vmatpush3.bf16.msra.mxu0 %v1600_v19 }
0x13b3   :  { %v2226_v51 = vld [vmem:[#allocation3 + $0x8] sm:$0xff]  ;;  %v2235_v57 = vld [vmem:[#allocation3 + $0x30] sm:$0xff] }
0x1476   :  { %v1075_v22 = vpop.f32.mrb[8].mxu1 }
0x1477   :  { %v1079_v23 = vadd.f32 %v1075_v22, %v241_v52  ;;  %v1536_v24 = vpop.f32.mrb[9].mxu1  ;;  %v2220_v52 = vld [vmem:[#allocation3 + $0x28] sm:$0xff] }
0x1479   :  { %1675 = vtanh.f32 %v1079_v23  ;;  %v1384_v26 = vmul.f32 -1.442695, %v1079_v23 }
0x147b   :  { %1677 = vpow2.f32 %v1384_v26 }
0x1483   :  { %v1676_v25 = vpop.eup %1675 }
0x1484   :  { %1089 = vrot.lane.b32.xlu1 %v1676_v25, %s1875_s2 }
0x1485   :  { %v1678_v29 = vpop.eup %1677 }
0x1486   :  { %v1083_v30 = vadd.f32 1.0, %v1678_v29 }
0x1488   :  { %1679 = vrcp.f32 %v1083_v30 }
0x1492   :  { %v1680_v32 = vpop.eup %1679 }
0x1493   :  { %v1087_v38 = vmul.f32 %v1680_v32, %v993_v15 }
0x14f6   :  { %v1090_v31 = vpop.permute.xlu1 %1089 }
0x14f7   :  { %v1092_v41 = vmul.f32 %v1680_v32, %v1090_v31 }
0x14f9   :  { %1094 = vrot.lane.b32.xlu0 %v1092_v41, %s1875_s2 }
0x156b   :  { %v1095_v50 = vpop.permute.xlu0 %1094 }
0x156c   :  { %v1097_v33 = vadd.f32 %v1095_v50, %v1087_v38 }
0x156e   :  { %1681 = vtanh.f32 %v1097_v33 }
0x156f   :  { %1683 = vtanh.f32 %v2217_v44 }
0x1570   :  { %1685 = vtanh.f32 %v2220_v52 }
0x1571   :  { %1687 = vtanh.f32 %v2226_v51 }
0x1572   :  { %1689 = vtanh.f32 %v2229_v53 }
0x1573   :  { %1691 = vtanh.f32 %v2232_v56 }
0x1574   :  { %1693 = vtanh.f32 %v2235_v57 }
0x1578   :  { %v1682_v43 = vpop.eup %1681 }
0x1579   :  { %1100 = vrot.lane.b32.xlu1 %v1682_v43, %s1875_s2  ;;  %v1684_v35 = vpop.eup %1683 }
0x157a   :  { %v1155_v37 = vmul.f32 %v1684_v35, %v1143_v36  ;;  %v1686_v40 = vpop.eup %1685 }
0x157b   :  { %v1157_v42 = vmul.f32 %v1686_v40, %v1143_v36  ;;  %v1688_v54 = vpop.eup %1687 }
0x157c   :  { %v1169_v12 = vsel %vm274_vm3, %v1155_v37, 0.0  ;;  %v1153_v58 = vmul.f32 %v1688_v54, %v1143_v36  ;;  %v1690_v59 = vpop.eup %1689 }
0x157d   :  { %v1175_v18 = vsel %vm274_vm3, %v1157_v42, 0.0  ;;  %v1154_v28 = vmul.f32 %v1690_v59, %v1143_v36  ;;  %v1692_v48 = vpop.eup %1691 }
0x157e   :  { %v1163_v60 = vsel %vm274_vm3, %v1153_v58, 0.0  ;;  %v1156_v61 = vmul.f32 %v1692_v48, %v1143_v36  ;;  %v1694_v62 = vpop.eup %1693 }
0x157f   :  { %v1166_v55 = vsel %vm274_vm3, %v1154_v28, 0.0  ;;  %v1158_v2 = vmul.f32 %v1694_v62, %v1143_v36 }
0x1580   :  { %v1172_v63 = vsel %vm274_vm3, %v1156_v61, 0.0 }
0x1581   :  { %v1178_v3 = vsel %vm274_vm3, %v1158_v2, 0.0 }
0x159d   :  { %1170 = vadd.xlane.f32.xlu1 %v1169_v12 }
0x15a1   :  { %1176 = vadd.xlane.f32.xlu1 %v1175_v18 }
0x15eb   :  { %v1101_v45 = vpop.permute.xlu1 %1100 }
0x15ec   :  { %v1103_v46 = vmul.f32 %v1680_v32, %v1101_v45 }
0x15ee   :  { %1105 = vrot.lane.b32.xlu0 %v1103_v46, %s1864_s19 }
0x160d   :  { %1164 = vadd.xlane.f32.xlu0 %v1163_v60 }
0x1611   :  { %1167 = vadd.xlane.f32.xlu0 %v1166_v55 }
0x1615   :  { %1173 = vadd.xlane.f32.xlu0 %v1172_v63 }
0x1619   :  { %1179 = vadd.xlane.f32.xlu0 %v1178_v3 }
0x162a   :  { %v1171_v21 = vpop.xlane.xlu1 %1170 }
0x162e   :  { %v1177_v23 = vpop.xlane.xlu1 %1176 }
0x1660   :  { %v1106_v4 = vpop.permute.xlu0 %1105 }
0x1661   :  { %1109 = vst.msk [vmem:[#allocation3 + $0x38] sm:$0xff] %vm274_vm3, %v1106_v4 }
0x1668   :  { %v1112_v1 = vld [vmem:[#allocation3 + $0x38] sm:$0xff] }
0x1669   :  { %v1113_v6 = vsel %vm1110_vm5, %v1111_v5, %v1112_v1  ;;  %v1115_v7 = vsel %vm1110_vm5, %v1112_v1, %v1111_v5 }
0x166a   :  { %1114 = vst.msk [vmem:[#allocation3] sm:$0xff] %vm274_vm3, %v1113_v6  ;;  %1116 = vst.msk [vmem:[#allocation3 + $0x38] sm:$0xff] %vm274_vm3, %v1115_v7 }
0x1671   :  { %v2249_v8 = vld [vmem:[#allocation3] sm:$0xff]  ;;  %v2251_v9 = vld [vmem:[#allocation3 + $0x38] sm:$0xff] }
0x1672   :  { %1695 = vtanh.f32 %v2249_v8 }
0x1673   :  { %1697 = vtanh.f32 %v2251_v9 }
0x167c   :  { %v1696_v10 = vpop.eup %1695 }
0x167d   :  { %v1698_v11 = vpop.eup %1697  ;;  %v1152_v49 = vmul.f32 %v1696_v10, %v1143_v36 }
0x167e   :  { %v1159_v14 = vmul.f32 %v1698_v11, %v1143_v36 }
0x167f   :  { %v1160_v13 = vsel %vm274_vm3, %v1152_v49, 0.0 }
0x1680   :  { %1161 = vadd.xlane.f32.xlu1 %v1160_v13  ;;  %v1181_v15 = vsel %vm274_vm3, %v1159_v14, 0.0 }
0x1684   :  { %1182 = vadd.xlane.f32.xlu1 %v1181_v15 }
0x169a   :  { %v1165_v20 = vpop.xlane.xlu0 %1164 }
0x169b   :  { %v1185_v32 = vmax.f32 %v1165_v20, %v1177_v23 }
0x169e   :  { %v1168_v22 = vpop.xlane.xlu0 %1167 }
0x16a2   :  { %v1174_v24 = vpop.xlane.xlu0 %1173 }
0x16a6   :  { %v1180_v26 = vpop.xlane.xlu0 %1179 }
0x16a7   :  { %v1186_v31 = vmax.f32 %v1168_v22, %v1180_v26 }
0x170d   :  { %v1162_v25 = vpop.xlane.xlu1 %1161 }
0x170e   :  { %v1184_v29 = vmax.f32 %v1162_v25, %v1174_v24 }
0x1710   :  { %v1188_v38 = vmax.f32 %v1184_v29, %v1185_v32 }
0x1711   :  { %v1183_v30 = vpop.xlane.xlu1 %1182 }
0x1712   :  { %v1187_v41 = vmax.f32 %v1171_v21, %v1183_v30 }
0x1714   :  { %v1189_v50 = vmax.f32 %v1186_v31, %v1187_v41 }
0x1716   :  { %v1190_v33 = vmax.f32 %v1188_v38, %v1189_v50 }
0x1718   :  { %v1191_v43 = vsub.f32 %v1162_v25, %v1190_v33  ;;  %v1192_v35 = vsub.f32 %v1165_v20, %v1190_v33  ;;  %v1193_v36 = vsub.f32 %v1168_v22, %v1190_v33  ;;  %v1194_v0 = vsub.f32 %v1171_v21, %v1190_v33 }
0x1719   :  { %v1195_v12 = vsub.f32 %v1174_v24, %v1190_v33  ;;  %v1196_v18 = vsub.f32 %v1177_v23, %v1190_v33  ;;  %v1197_v46 = vsub.f32 %v1180_v26, %v1190_v33  ;;  %v1198_v58 = vsub.f32 %v1183_v30, %v1190_v33 }
0x171a   :  { %v1199_v37 = vmul.f32 1.442695, %v1191_v43  ;;  %v1201_v40 = vmul.f32 1.442695, %v1192_v35  ;;  %v1203_v42 = vmul.f32 1.442695, %v1193_v36 }
0x171b   :  { %v1205_v45 = vmul.f32 1.442695, %v1194_v0  ;;  %v1207_v54 = vmul.f32 1.442695, %v1195_v12  ;;  %v1209_v59 = vmul.f32 1.442695, %v1196_v18 }
0x171c   :  { %1699 = vpow2.f32 %v1199_v37  ;;  %v1211_v60 = vmul.f32 1.442695, %v1197_v46  ;;  %v1213_v28 = vmul.f32 1.442695, %v1198_v58 }
0x171d   :  { %1701 = vpow2.f32 %v1201_v40 }
0x171e   :  { %1703 = vpow2.f32 %v1203_v42 }
0x171f   :  { %1705 = vpow2.f32 %v1205_v45 }
0x1720   :  { %1707 = vpow2.f32 %v1207_v54 }
0x1721   :  { %1709 = vpow2.f32 %v1209_v59 }
0x1722   :  { %1711 = vpow2.f32 %v1211_v60 }
0x1723   :  { %1713 = vpow2.f32 %v1213_v28 }
0x1726   :  { %v1700_v48 = vpop.eup %1699 }
0x1727   :  { %v1702_v55 = vpop.eup %1701 }
0x1728   :  { %v1215_v61 = vadd.f32 %v1702_v55, %v1700_v48  ;;  %v1704_v62 = vpop.eup %1703 }
0x1729   :  { %v1706_v2 = vpop.eup %1705 }
0x172a   :  { %v1216_v63 = vadd.f32 %v1704_v62, %v1215_v61  ;;  %v1708_v4 = vpop.eup %1707 }
0x172b   :  { %v1710_v1 = vpop.eup %1709 }
0x172c   :  { %v1217_v3 = vadd.f32 %v1706_v2, %v1216_v63  ;;  %v1712_v7 = vpop.eup %1711 }
0x172d   :  { %v1714_v11 = vpop.eup %1713 }
0x172e   :  { %v1218_v5 = vadd.f32 %v1708_v4, %v1217_v3 }
0x1730   :  { %v1219_v6 = vadd.f32 %v1710_v1, %v1218_v5 }
0x1732   :  { %v1220_v10 = vadd.f32 %v1712_v7, %v1219_v6 }
0x1734   :  { %v1221_v49 = vadd.f32 %v1714_v11, %v1220_v10 }
0x1736   :  { %1715 = vrcp.f32 %v1221_v49 }
0x1740   :  { %v1716_v13 = vpop.eup %1715 }
0x1741   :  { %v1223_v14 = vmul.f32 %v1716_v13, %v1700_v48  ;;  %v1224_v15 = vmul.f32 %v1716_v13, %v1702_v55  ;;  %v1225_v34 = vmul.f32 %v1716_v13, %v1704_v62  ;;  %v1226_v39 = vmul.f32 %v1716_v13, %v1706_v2 }
0x1742   :  { %v1227_v47 = vmul.f32 %v1716_v13, %v1708_v4  ;;  %v1228_v20 = vmul.f32 %v1716_v13, %v1710_v1  ;;  %v1229_v25 = vmul.f32 %v1716_v13, %v1712_v7  ;;  %v1230_v32 = vmul.f32 %v1716_v13, %v1714_v11 }
0x1743   :  { %v1231_v16 = vmul.f32 %v1223_v14, %v2249_v8  ;;  %v1232_v17 = vmul.f32 %v1224_v15, %v2226_v51  ;;  %v1233_v19 = vmul.f32 %v1225_v34, %v2229_v53  ;;  %v1234_v21 = vmul.f32 %v1226_v39, %v2217_v44 }
0x1744   :  { %v1235_v26 = vmul.f32 %v1227_v47, %v2232_v56  ;;  %v1236_v8 = vmul.f32 %v1228_v20, %v2220_v52  ;;  %v1237_v31 = vmul.f32 %v1229_v25, %v2235_v57  ;;  %v1238_v38 = vmul.f32 %v1230_v32, %v2251_v9  ;;  %v1259_v57 = vld [vmem:[%s2299_s8] sm:$0xff]  ;;  %s1833_s8 = scalar_lea.vmem %s1352_s13, 128 }
0x1745   :  { %v1239_v22 = vsel %vm274_vm3, %v1231_v16, 0.0  ;;  %v1240_v23 = vsel %vm274_vm3, %v1232_v17, 0.0  ;;  %v1242_v29 = vsel %vm274_vm3, %v1233_v19, 0.0  ;;  %v1244_v51 = vsel %vm274_vm3, %v1234_v21, 0.0  ;;  %p1834_p12 = scmp.ne.s32.totalorder %s1352_s13, %s1833_s8  ;;  %p1839_p0 = scmp.lt.s32.totalorder %s1833_s8, %s1833_s8 }
0x1746   :  { %v1241_v24 = vadd.f32 %v1240_v23, %v1239_v22  ;;  %v1246_v44 = vsel %vm274_vm3, %v1235_v26, 0.0  ;;  %v1248_v50 = vsel %vm274_vm3, %v1236_v8, 0.0  ;;  %v1250_v56 = vsel %vm274_vm3, %v1237_v31, 0.0 }
0x1747   :  { %v1252_v35 = vsel %vm274_vm3, %v1238_v38, 0.0  ;;  %p1840_p1 = por %p1839_p0, %p1838_p13 }
0x1748   :  { %v1243_v30 = vadd.f32 %v1242_v29, %v1241_v24 }
0x1749   :  { %p1841_p2 = pnand %p1840_p1, %p1834_p12 }
0x174a   :  { %v1245_v53 = vadd.f32 %v1244_v51, %v1243_v30 }
0x174c   :  { %v1247_v41 = vadd.f32 %v1246_v44, %v1245_v53 }
0x174e   :  { %v1249_v33 = vadd.f32 %v1248_v50, %v1247_v41 }
0x1750   :  { %v1251_v43 = vadd.f32 %v1250_v56, %v1249_v33 }
0x1752   :  { %v1253_v36 = vadd.f32 %v1252_v35, %v1251_v43 }
0x1754   :  { %1717 = vtanh.f32 %v1253_v36 }
0x175e   :  { %v1718_v52 = vpop.eup %1717 }
0x175f   :  { %1546 = vmatmul.mubr.msk.f32.vlgmr.msra.gmra.mrb[14].mxu0 %vm274_vm3, %v1718_v52 }
0x1832   :  { %v1329_v0 = vpop.f32.mrb[14].mxu0 }
0x1833   :  { %v1330_v9 = vadd.f32 %v1329_v0, %v1259_v57  ;;  %v1547_v37 = vpop.f32.mrb[15].mxu0 }
0x1835   :  { %v1334_v40 = vsel %vm1333_vm6, %v1330_v9, -1e+30 }
0x1836   :  { %1335 = vmax.xlane.f32.xlu0 %v1334_v40 }
0x18c3   :  { %v1336_v12 = vpop.xlane.xlu0 %1335 }
0x18c4   :  { %v1337_v42 = vsub.f32 %v1334_v40, %v1336_v12 }
0x18c6   :  { %v1338_v18 = vmul.f32 1.442695, %v1337_v42 }
0x18c8   :  { %1719 = vpow2.f32 %v1338_v18 }
0x18d2   :  { %v1720_v45 = vpop.eup %1719 }
0x18d3   :  { %1340 = vadd.xlane.f32.xlu1 %v1720_v45 }
0x1960   :  { %v1341_v46 = vpop.xlane.xlu1 %1340 }
0x1961   :  { %1721 = vrcp.f32 %v1341_v46 }
0x196b   :  { %v1722_v54 = vpop.eup %1721 }
0x196c   :  { %v1343_v58 = vmul.f32 %v1722_v54, %v1720_v45 }
0x196e   :  { %1344 = vst [vmem:[#allocation13] sm:$0xff] %v1343_v58 }
0x196f   :  { %1844 = shalt.err (!%p1841_p2)
}
0x1970   :  { %s1845_s14 = scalar_lea.hbm %s2300_s9, 128 }
0x1971   :  { %p1846_p3 = scmp.ne.s32.totalorder %s2300_s9, %s1845_s14  ;;  %p1849_p4 = scmp.lt.u32.totalorder %s1845_s14, %s2300_s9 }
0x1973   :  { %p1851_p5 = pnand %p1849_p4, %p1846_p3 }
0x1975   :  { %1854 = shalt.err (!%p1851_p5)
}
0x1976   :  { %1354 = dma.vmem_to_hbm [thread:$0]  %s1352_s13, 128, %s2300_s9, [#allocation6]  }
0x1977   :  { %1861 = dma.done.wait [#allocation6], 128  }
0x1978   :  { %1862 = vsyncadd [#allocation6], 4294967168 }
0x1979   :  { %1358 = vsyncpa [#allocation5], 1 }
0x197a   :  { %1359 = vsyncpa [#allocation8], 1 }
0x197b   :  { %1360 = vsyncpa [#allocation11], 1 }
0x197c   :  { %1361 = vsyncpa [#allocation6], 1 }

</bundles_post_ra>
